<compile_context>
chip_gen: v6e
topology: v6e:2x2x1
jax: 0.10.0
libtpu: 0.0.40
codegen_flags: <defaults>
</compile_context>

<pallas_src>
import functools

import jax
import jax.numpy as jnp
from jax.experimental import pallas as pl
from jax.experimental.pallas import tpu as pltpu

LANE = 128
EPS = 1e-5
LRELU_SLOPE = 0.2
_TK_CAP = 2048


def _round_up(n, m):
    return ((n + m - 1) // m) * m


def _vmem_limit_bytes():
    # ~40 MiB on v7x (64 MiB physical) or unknown chips; ~96 MiB on v5e/v6e.
    try:
        cap = pltpu.get_tpu_info().vmem_capacity_bytes
    except Exception:
        cap = 64 * 1024 * 1024
    return 96 * 1024 * 1024 if cap >= 128 * 1024 * 1024 else 40 * 1024 * 1024


def _pick_m_tiling(m, cap=1024):
    """Pad M to a sublane multiple and pick a tile size that divides it."""
    if m <= cap:
        m_pad = _round_up(m, 8)
        return m_pad, m_pad
    m_pad = _round_up(m, 256)
    t = cap
    while t > 256:
        if m_pad % t == 0:
            return m_pad, t
        t //= 2
    return m_pad, 256


# --------------------------------------------------------------------------
# Pallas kernels: bf16 MXU matmul -> +bias -> BN batch-stat partials
#                 (+ optional sigmoid epilogue)
# --------------------------------------------------------------------------
def _write_stats(st_ref, r, real_m, tile_m, mask_rows):
    rm = r
    if mask_rows:
        rows = (jax.lax.broadcasted_iota(jnp.int32, r.shape, 0)
                + pl.program_id(0) * tile_m)
        rm = jnp.where(rows < real_m, r, 0.0)
    st_ref[...] = jnp.zeros_like(st_ref)
    st_ref[0:1, :] = jnp.sum(rm, axis=0, keepdims=True)
    st_ref[1:2, :] = jnp.sum(rm * rm, axis=0, keepdims=True)


def _epilogue(o_ref, st_ref, r, post_act, real_m, tile_m, mask_rows):
    # Per-channel partial sums for this layer's training-mode BatchNorm,
    # emitted while the tile is still in VMEM (no separate stats pass).
    _write_stats(st_ref, r, real_m, tile_m, mask_rows)
    if post_act == "sigmoid":
        r = pl.reciprocal(1.0 + jnp.exp(-r), approx=True)   # EUP exp + vrcp
    o_ref[...] = r.astype(o_ref.dtype)


def _conv_mm_kernel(a_ref, w_ref, b_ref, o_ref, st_ref, *,
                    post_act, real_m, tile_m, mask_rows):
    # gk == 1 fast path: single MXU pass, no accumulator scratch.
    r = jnp.dot(a_ref[...], w_ref[...],
                preferred_element_type=jnp.float32) + b_ref[...]
    _epilogue(o_ref, st_ref, r, post_act, real_m, tile_m, mask_rows)


def _conv_mm_kernel_kloop(a_ref, w_ref, b_ref, o_ref, st_ref, acc_ref, *,
                          post_act, real_m, tile_m, mask_rows):
    # K-tiled accumulator path (only used when K > _TK_CAP, e.g. d=64 conv5).
    k = pl.program_id(2)

    @pl.when(k == 0)
    def _():
        acc_ref[...] = jnp.zeros_like(acc_ref)

    acc_ref[...] += jnp.dot(a_ref[...], w_ref[...],
                            preferred_element_type=jnp.float32)

    @pl.when(k == pl.num_programs(2) - 1)
    def _():
        r = acc_ref[...] + b_ref[...]
        _epilogue(o_ref, st_ref, r, post_act, real_m, tile_m, mask_rows)


def _matmul_fused(patches, w2d, b2d, *, post_act, out_dtype):
    m, k = patches.shape
    _, n = w2d.shape
    m_pad, tm = _pick_m_tiling(m)
    if m_pad != m:
        patches = jnp.pad(patches, ((0, m_pad - m), (0, 0)))
    mask_rows = m_pad != m
    gm = m_pad // tm
    tn = 256 if (n % 256 == 0 and gm >= 2) else LANE
    gn = n // tn
    # Give v7x's two TensorCores a second parallel grid step when it is cheap.
    if gm == 1 and gn == 1 and m_pad >= 256 and (m_pad // 2) % 8 == 0:
        tm = m_pad // 2
        gm = 2
    vmem_limit = _vmem_limit_bytes()

    if k <= _TK_CAP:
        kernel = functools.partial(_conv_mm_kernel, post_act=post_act,
                                   real_m=m, tile_m=tm, mask_rows=mask_rows)
        out, stats = pl.pallas_call(
            kernel,
            out_shape=(jax.ShapeDtypeStruct((m_pad, n), out_dtype),
                       jax.ShapeDtypeStruct((gm * 8, n), jnp.float32)),
            grid_spec=pltpu.PrefetchScalarGridSpec(
                num_scalar_prefetch=0,
                grid=(gm, gn),
                in_specs=[
                    pl.BlockSpec((tm, k), lambda i, j: (i, 0)),
                    pl.BlockSpec((k, tn), lambda i, j: (0, j)),
                    pl.BlockSpec((1, tn), lambda i, j: (0, j)),
                ],
                out_specs=(pl.BlockSpec((tm, tn), lambda i, j: (i, j)),
                           pl.BlockSpec((8, tn), lambda i, j: (i, j))),
            ),
            compiler_params=pltpu.CompilerParams(
                dimension_semantics=("parallel", "parallel"),
                vmem_limit_bytes=vmem_limit),
        )(patches, w2d, b2d)
    else:
        tk = _TK_CAP
        while k % tk != 0 and tk > LANE:
            tk //= 2
        gk = k // tk
        kernel = functools.partial(_conv_mm_kernel_kloop, post_act=post_act,
                                   real_m=m, tile_m=tm, mask_rows=mask_rows)
        out, stats = pl.pallas_call(
            kernel,
            out_shape=(jax.ShapeDtypeStruct((m_pad, n), out_dtype),
                       jax.ShapeDtypeStruct((gm * 8, n), jnp.float32)),
            grid_spec=pltpu.PrefetchScalarGridSpec(
                num_scalar_prefetch=0,
                grid=(gm, gn, gk),
                in_specs=[
                    pl.BlockSpec((tm, tk), lambda i, j, kk: (i, kk)),
                    pl.BlockSpec((tk, tn), lambda i, j, kk: (kk, j)),
                    pl.BlockSpec((1, tn), lambda i, j, kk: (0, j)),
                ],
                out_specs=(pl.BlockSpec((tm, tn), lambda i, j, kk: (i, j)),
                           pl.BlockSpec((8, tn), lambda i, j, kk: (i, j))),
                scratch_shapes=[pltpu.VMEM((tm, tn), jnp.float32)],
            ),
            compiler_params=pltpu.CompilerParams(
                dimension_semantics=("parallel", "parallel", "arbitrary"),
                vmem_limit_bytes=vmem_limit),
        )(patches, w2d, b2d)
    return out[:m], stats


# --------------------------------------------------------------------------
# Glue: one-time weight packing, im2col, pre-activations (plain JAX)
# --------------------------------------------------------------------------
def prepare_params(params):
    """One-time packing of weights/bias into bf16 lane-dense matrices."""
    prep = {}
    for name in ["conv1", "conv2", "conv3", "conv4", "conv5"]:
        w, b = params[name]
        cout, cin, kh, kw = w.shape
        cin8 = _round_up(cin, 8)
        n_pad = _round_up(cout, LANE)
        wt = jnp.transpose(w, (2, 3, 1, 0))                 # (kh, kw, cin, cout)
        wt = jnp.pad(wt, ((0, 0), (0, 0), (0, cin8 - cin), (0, n_pad - cout)))
        prep[name] = {
            "w2d": wt.reshape(kh * kw * cin8, n_pad).astype(jnp.bfloat16),
            "b2d": jnp.pad(b, (0, n_pad - cout)).reshape(1, n_pad)
                      .astype(jnp.float32),
        }
        bn = name + "_bn"
        if bn in params:
            prep[bn] = params[bn]
    return prep


def _im2col(xp, kh, kw, stride):
    # xp: (N, H, W, C) bf16, already spatially padded & pre-activated
    n, h, w, c = xp.shape
    ho = (h - kh) // stride + 1
    wo = (w - kw) // stride + 1
    cols = []
    for i in range(kh):
        for j in range(kw):
            cols.append(xp[:, i:i + (ho - 1) * stride + 1:stride,
                           j:j + (wo - 1) * stride + 1:stride, :])
    p = jnp.stack(cols, axis=3)                             # (N,Ho,Wo,kh*kw,C)
    return p.reshape(n * ho * wo, kh * kw * c), (n, ho, wo)


def _conv_layer(x_nhwc, packed, *, stride, post_act="none",
                out_dtype=jnp.bfloat16):
    # x_nhwc is already pre-activated (bf16); PyTorch zero-pads after the
    # activation, so a plain zero pad here is exact.
    xp = jnp.pad(x_nhwc, ((0, 0), (1, 1), (1, 1), (0, 0)))
    patches, sh = _im2col(xp, 4, 4, stride)
    out2d, stats = _matmul_fused(patches, packed["w2d"], packed["b2d"],
                                 post_act=post_act, out_dtype=out_dtype)
    return out2d, sh, stats


def _pre_act_lrelu(a):
    return jnp.where(a > 0, a, LRELU_SLOPE * a)


def _pre_act_bn_lrelu(a_bf16, scale_c, shift_c):
    a = a_bf16.astype(jnp.float32) * scale_c + shift_c
    a = jnp.where(a > 0, a, LRELU_SLOPE * a)
    return a.astype(jnp.bfloat16)


def _bn_scale_shift(stats, m_rows, gamma, beta, c8):
    # training-mode BatchNorm from fused partial sums (biased variance)
    st = stats.reshape(-1, 8, stats.shape[-1])
    s = jnp.sum(st[:, 0, :], axis=0)[:c8]
    sq = jnp.sum(st[:, 1, :], axis=0)[:c8]
    mean = s / m_rows
    var = jnp.maximum(sq / m_rows - mean * mean, 0.0)        # clamp cancellation
    creal = gamma.shape[0]
    g8 = jnp.pad(gamma, (0, c8 - creal), constant_values=1.0)
    b8 = jnp.pad(beta, (0, c8 - creal))
    scale = g8 * jax.lax.rsqrt(var + EPS)
    shift = b8 - mean * scale
    return scale, shift


def _to_nhwc(out2d, sh, c8):
    n, ho, wo = sh
    return out2d[:, :c8].reshape(n, ho, wo, c8)


def discriminator_forward(prep, x_nchw, y_nchw, *, d=8):
    couts = [d, d * 2, d * 4, d * 8, 1]
    c8 = [_round_up(c, 8) for c in couts]

    # torch.cat([input, real_out], dim=1)  -> NHWC, channel-pad, bf16
    x = jnp.concatenate([x_nchw, y_nchw], axis=1).astype(jnp.float32)
    x = jnp.transpose(x, (0, 2, 3, 1))
    cin8 = _round_up(x.shape[-1], 8)
    x = jnp.pad(x, ((0, 0), (0, 0), (0, 0), (0, cin8 - x.shape[-1])))
    x = x.astype(jnp.bfloat16)

    # conv1 (no BatchNorm of its own -> stats unused)
    out1, sh1, _ = _conv_layer(x, prep["conv1"], stride=2)
    a1 = _to_nhwc(out1, sh1, c8[0])

    # conv2: pre-activation = LeakyReLU(conv1)
    out2, sh2, st2 = _conv_layer(_pre_act_lrelu(a1), prep["conv2"], stride=2)
    sc2, sf2 = _bn_scale_shift(st2, out2.shape[0], *prep["conv2_bn"], c8[1])
    a2 = _to_nhwc(out2, sh2, c8[1])

    # conv3: pre-activation = LeakyReLU(BN2(conv2))
    out3, sh3, st3 = _conv_layer(_pre_act_bn_lrelu(a2, sc2, sf2),
                                 prep["conv3"], stride=2)
    sc3, sf3 = _bn_scale_shift(st3, out3.shape[0], *prep["conv3_bn"], c8[2])
    a3 = _to_nhwc(out3, sh3, c8[2])

    # conv4: pre-activation = LeakyReLU(BN3(conv3))
    out4, sh4, st4 = _conv_layer(_pre_act_bn_lrelu(a3, sc3, sf3),
                                 prep["conv4"], stride=1)
    sc4, sf4 = _bn_scale_shift(st4, out4.shape[0], *prep["conv4_bn"], c8[3])
    a4 = _to_nhwc(out4, sh4, c8[3])

    # conv5: pre-activation = LeakyReLU(BN4(conv4)); sigmoid epilogue, f32 out
    out5, sh5, _ = _conv_layer(_pre_act_bn_lrelu(a4, sc4, sf4),
                               prep["conv5"], stride=1,
                               post_act="sigmoid", out_dtype=jnp.float32)
    n, ho, wo = sh5
    out = out5[:, :1].reshape(n, ho, wo, 1)
    return jnp.transpose(out, (0, 3, 1, 2))                  # -> NCHW


# --------------------------------------------------------------------------
# Deterministic parameter init (shapes from DISCRIMINATOR.__init__)
# --------------------------------------------------------------------------
def init_params(key, d=8):
    cfg = [("conv1", 6, d, False),
           ("conv2", d, d * 2, True),
           ("conv3", d * 2, d * 4, True),
           ("conv4", d * 4, d * 8, True),
           ("conv5", d * 8, 1, False)]
    params = {}
    for name, cin, cout, has_bn in cfg:
        key, kw_, kb, kg, kbe = jax.random.split(key, 5)
        params[name] = (0.02 * jax.random.normal(kw_, (cout, cin, 4, 4),
                                                 jnp.float32),
                        0.01 * jax.random.normal(kb, (cout,), jnp.float32))
        if has_bn:
            params[name + "_bn"] = (
                1.0 + 0.1 * jax.random.normal(kg, (cout,), jnp.float32),
                0.1 * jax.random.normal(kbe, (cout,), jnp.float32))
    return params


# --------------------------------------------------------------------------
# Pure-JAX reference (mirrors the PyTorch forward) for a sanity check
# --------------------------------------------------------------------------
def _reference_forward(params, x_nchw, y_nchw):
    x = jnp.concatenate([x_nchw, y_nchw], axis=1).astype(jnp.float32)

    def conv(t, w, b, s):
        y = jax.lax.conv_general_dilated(
            t, w, window_strides=(s, s), padding=((1, 1), (1, 1)),
            dimension_numbers=("NCHW", "OIHW", "NCHW"))
        return y + b.reshape(1, -1, 1, 1)

    def bn(t, g, be):
        mu = jnp.mean(t, axis=(0, 2, 3), keepdims=True)
        var = jnp.mean((t - mu) ** 2, axis=(0, 2, 3), keepdims=True)
        return ((t - mu) * jax.lax.rsqrt(var + EPS) * g.reshape(1, -1, 1, 1)
                + be.reshape(1, -1, 1, 1))

    lrelu = lambda t: jnp.where(t > 0, t, LRELU_SLOPE * t)
    x = lrelu(conv(x, *params["conv1"], 2))
    x = lrelu(bn(conv(x, *params["conv2"], 2), *params["conv2_bn"]))
    x = lrelu(bn(conv(x, *params["conv3"], 2), *params["conv3_bn"]))
    x = lrelu(bn(conv(x, *params["conv4"], 1), *params["conv4_bn"]))
    x = conv(x, *params["conv5"], 1)
    return 1.0 / (1.0 + jnp.exp(-x))


if __name__ == "__main__":
    key = jax.random.PRNGKey(0)
    pkey, xkey, ykey = jax.random.split(key, 3)
    d = 8
    params = init_params(pkey, d=d)
    prep = prepare_params(params)            # one-time packing, outside jit
    # 32x32 input: 32 -> 16 -> 8 -> 4 -> 3 -> 2 through the five convs
    x = jax.random.normal(xkey, (2, 3, 32, 32), jnp.float32)
    y = jax.random.normal(ykey, (2, 3, 32, 32), jnp.float32)

    fwd = jax.jit(functools.partial(discriminator_forward, d=d))
    out = jax.block_until_ready(fwd(prep, x, y))

    assert out.shape == (2, 1, 2, 2), out.shape
    assert out.dtype == jnp.float32
    assert bool(jnp.all(jnp.isfinite(out)))
    assert bool(jnp.all((out >= 0.0) & (out <= 1.0)))        # sigmoid range

    ref = _reference_forward(params, x, y)
    max_err = float(jnp.max(jnp.abs(out - ref)))
    assert max_err < 5e-2, max_err                           # loose: bf16 path
    print("KERNEL_OK")
</pallas_src>

<mosaic_0001>
module attributes {stable_mosaic.version = 11 : i64} {
  func.func @_conv_mm_kernel(%arg0: i32, %arg1: i32, %arg2: memref<256x128xbf16, #tpu.memory_space<vmem>>, %arg3: memref<128x128xbf16, #tpu.memory_space<vmem>>, %arg4: memref<1x128xf32, #tpu.memory_space<vmem>>, %arg5: memref<256x128xbf16, #tpu.memory_space<vmem>>, %arg6: memref<8x128xf32, #tpu.memory_space<vmem>>) attributes {dimension_semantics = [#tpu.dimension_semantics<parallel>, #tpu.dimension_semantics<parallel>], iteration_bounds = array<i64: 2, 1>, scalar_prefetch = 0 : i64, scratch_operands = 0 : i64, tpu.core_type = #tpu.core_type<tc>, window_params = [{transform_indices = @transform_0, window_bounds = array<i64: 256, 128>}, {transform_indices = @transform_1, window_bounds = array<i64: 128, 128>}, {transform_indices = @transform_2, window_bounds = array<i64: 1, 128>}, {transform_indices = @transform_3, window_bounds = array<i64: 256, 128>}, {transform_indices = @transform_4, window_bounds = array<i64: 8, 128>}]} {
    %c0 = arith.constant 0 : index
    %c0_0 = arith.constant 0 : index
    %0 = vector.load %arg2[%c0, %c0_0] : memref<256x128xbf16, #tpu.memory_space<vmem>>, vector<256x128xbf16>
    %c0_1 = arith.constant 0 : index
    %c0_2 = arith.constant 0 : index
    %1 = vector.load %arg3[%c0_1, %c0_2] : memref<128x128xbf16, #tpu.memory_space<vmem>>, vector<128x128xbf16>
    %cst = arith.constant dense<0.000000e+00> : vector<256x128xf32>
    %2 = tpu.matmul %0, %1, %cst {dimension_numbers = #tpu.dot_dimension_numbers<[1], [0], [0], [1], [0, 0, 1, 1], [], []>} : vector<256x128xbf16>, vector<128x128xbf16>, vector<256x128xf32> -> vector<256x128xf32>
    %c0_3 = arith.constant 0 : index
    %c0_4 = arith.constant 0 : index
    %3 = vector.load %arg4[%c0_3, %c0_4] : memref<1x128xf32, #tpu.memory_space<vmem>>, vector<1x128xf32>
    %4 = vector.broadcast %3 : vector<1x128xf32> to vector<256x128xf32>
    %5 = arith.addf %2, %4 : vector<256x128xf32>
    %cst_5 = arith.constant 0.000000e+00 : f32
    %6 = vector.broadcast %cst_5 : f32 to vector<8x128xf32>
    %c0_6 = arith.constant 0 : index
    %c0_7 = arith.constant 0 : index
    %7 = vector.load %arg6[%c0_6, %c0_7] : memref<8x128xf32, #tpu.memory_space<vmem>>, vector<8x128xf32>
    tpu.vector_store %arg6[%c0_6, %c0_7], %6 {strides = array<i32>} : memref<8x128xf32, #tpu.memory_space<vmem>>, vector<8x128xf32>,
    %cst_8 = arith.constant dense<0.000000e+00> : vector<128xf32>
    %8 = vector.multi_reduction <add>, %5, %cst_8 [0] : vector<256x128xf32> to vector<128xf32>
    %9 = vector.shape_cast %8 : vector<128xf32> to vector<1x128xf32>
    %c0_9 = arith.constant 0 : index
    %c0_10 = arith.constant 0 : index
    %10 = vector.load %arg6[%c0_9, %c0_10] : memref<8x128xf32, #tpu.memory_space<vmem>>, vector<1x128xf32>
    tpu.vector_store %arg6[%c0_9, %c0_10], %9 {strides = array<i32>} : memref<8x128xf32, #tpu.memory_space<vmem>>, vector<1x128xf32>,
    %11 = arith.mulf %5, %5 : vector<256x128xf32>
    %cst_11 = arith.constant dense<0.000000e+00> : vector<128xf32>
    %12 = vector.multi_reduction <add>, %11, %cst_11 [0] : vector<256x128xf32> to vector<128xf32>
    %13 = vector.shape_cast %12 : vector<128xf32> to vector<1x128xf32>
    %c1 = arith.constant 1 : index
    %c0_12 = arith.constant 0 : index
    %14 = vector.load %arg6[%c1, %c0_12] : memref<8x128xf32, #tpu.memory_space<vmem>>, vector<1x128xf32>
    tpu.vector_store %arg6[%c1, %c0_12], %13 {strides = array<i32>} : memref<8x128xf32, #tpu.memory_space<vmem>>, vector<1x128xf32>,
    %15 = arith.truncf %5 : vector<256x128xf32> to vector<256x128xbf16>
    %c0_13 = arith.constant 0 : index
    %c0_14 = arith.constant 0 : index
    %16 = vector.load %arg5[%c0_13, %c0_14] : memref<256x128xbf16, #tpu.memory_space<vmem>>, vector<256x128xbf16>
    tpu.vector_store %arg5[%c0_13, %c0_14], %15 {strides = array<i32>} : memref<256x128xbf16, #tpu.memory_space<vmem>>, vector<256x128xbf16>,
    return
  }
  func.func @transform_0(%arg0: i32, %arg1: i32) -> (i32, i32) {
    %c0_i32 = arith.constant 0 : i32
    %c0_i32_0 = arith.constant 0 : i32
    return %arg0, %c0_i32 : i32, i32
  }
  func.func @transform_1(%arg0: i32, %arg1: i32) -> (i32, i32) {
    %c0_i32 = arith.constant 0 : i32
    %c0_i32_0 = arith.constant 0 : i32
    return %c0_i32, %arg1 : i32, i32
  }
  func.func @transform_2(%arg0: i32, %arg1: i32) -> (i32, i32) {
    %c0_i32 = arith.constant 0 : i32
    %c0_i32_0 = arith.constant 0 : i32
    return %c0_i32, %arg1 : i32, i32
  }
  func.func @transform_3(%arg0: i32, %arg1: i32) -> (i32, i32) {
    %c0_i32 = arith.constant 0 : i32
    return %arg0, %arg1 : i32, i32
  }
  func.func @transform_4(%arg0: i32, %arg1: i32) -> (i32, i32) {
    %c0_i32 = arith.constant 0 : i32
    return %arg0, %arg1 : i32, i32
  }
}

module attributes {stable_mosaic.version = 11 : i64} {
  func.func @_conv_mm_kernel(%arg0: i32, %arg1: i32, %arg2: memref<128x128xbf16, #tpu.memory_space<vmem>>, %arg3: memref<128x128xbf16, #tpu.memory_space<vmem>>, %arg4: memref<1x128xf32, #tpu.memory_space<vmem>>, %arg5: memref<128x128xbf16, #tpu.memory_space<vmem>>, %arg6: memref<8x128xf32, #tpu.memory_space<vmem>>) attributes {dimension_semantics = [#tpu.dimension_semantics<parallel>, #tpu.dimension_semantics<parallel>], iteration_bounds = array<i64: 1, 1>, scalar_prefetch = 0 : i64, scratch_operands = 0 : i64, tpu.core_type = #tpu.core_type<tc>, window_params = [{transform_indices = @transform_0, window_bounds = array<i64: 128, 128>}, {transform_indices = @transform_1, window_bounds = array<i64: 128, 128>}, {transform_indices = @transform_2, window_bounds = array<i64: 1, 128>}, {transform_indices = @transform_3, window_bounds = array<i64: 128, 128>}, {transform_indices = @transform_4, window_bounds = array<i64: 8, 128>}]} {
    %c0 = arith.constant 0 : index
    %c0_0 = arith.constant 0 : index
    %0 = vector.load %arg2[%c0, %c0_0] : memref<128x128xbf16, #tpu.memory_space<vmem>>, vector<128x128xbf16>
    %c0_1 = arith.constant 0 : index
    %c0_2 = arith.constant 0 : index
    %1 = vector.load %arg3[%c0_1, %c0_2] : memref<128x128xbf16, #tpu.memory_space<vmem>>, vector<128x128xbf16>
    %cst = arith.constant dense<0.000000e+00> : vector<128x128xf32>
    %2 = tpu.matmul %0, %1, %cst {dimension_numbers = #tpu.dot_dimension_numbers<[1], [0], [0], [1], [0, 0, 1, 1], [], []>} : vector<128x128xbf16>, vector<128x128xbf16>, vector<128x128xf32> -> vector<128x128xf32>
    %c0_3 = arith.constant 0 : index
    %c0_4 = arith.constant 0 : index
    %3 = vector.load %arg4[%c0_3, %c0_4] : memref<1x128xf32, #tpu.memory_space<vmem>>, vector<1x128xf32>
    %4 = vector.broadcast %3 : vector<1x128xf32> to vector<128x128xf32>
    %5 = arith.addf %2, %4 : vector<128x128xf32>
    %cst_5 = arith.constant 0.000000e+00 : f32
    %6 = vector.broadcast %cst_5 : f32 to vector<8x128xf32>
    %c0_6 = arith.constant 0 : index
    %c0_7 = arith.constant 0 : index
    %7 = vector.load %arg6[%c0_6, %c0_7] : memref<8x128xf32, #tpu.memory_space<vmem>>, vector<8x128xf32>
    tpu.vector_store %arg6[%c0_6, %c0_7], %6 {strides = array<i32>} : memref<8x128xf32, #tpu.memory_space<vmem>>, vector<8x128xf32>,
    %cst_8 = arith.constant dense<0.000000e+00> : vector<128xf32>
    %8 = vector.multi_reduction <add>, %5, %cst_8 [0] : vector<128x128xf32> to vector<128xf32>
    %9 = vector.shape_cast %8 : vector<128xf32> to vector<1x128xf32>
    %c0_9 = arith.constant 0 : index
    %c0_10 = arith.constant 0 : index
    %10 = vector.load %arg6[%c0_9, %c0_10] : memref<8x128xf32, #tpu.memory_space<vmem>>, vector<1x128xf32>
    tpu.vector_store %arg6[%c0_9, %c0_10], %9 {strides = array<i32>} : memref<8x128xf32, #tpu.memory_space<vmem>>, vector<1x128xf32>,
    %11 = arith.mulf %5, %5 : vector<128x128xf32>
    %cst_11 = arith.constant dense<0.000000e+00> : vector<128xf32>
    %12 = vector.multi_reduction <add>, %11, %cst_11 [0] : vector<128x128xf32> to vector<128xf32>
    %13 = vector.shape_cast %12 : vector<128xf32> to vector<1x128xf32>
    %c1 = arith.constant 1 : index
    %c0_12 = arith.constant 0 : index
    %14 = vector.load %arg6[%c1, %c0_12] : memref<8x128xf32, #tpu.memory_space<vmem>>, vector<1x128xf32>
    tpu.vector_store %arg6[%c1, %c0_12], %13 {strides = array<i32>} : memref<8x128xf32, #tpu.memory_space<vmem>>, vector<1x128xf32>,
    %15 = arith.truncf %5 : vector<128x128xf32> to vector<128x128xbf16>
    %c0_13 = arith.constant 0 : index
    %c0_14 = arith.constant 0 : index
    %16 = vector.load %arg5[%c0_13, %c0_14] : memref<128x128xbf16, #tpu.memory_space<vmem>>, vector<128x128xbf16>
    tpu.vector_store %arg5[%c0_13, %c0_14], %15 {strides = array<i32>} : memref<128x128xbf16, #tpu.memory_space<vmem>>, vector<128x128xbf16>,
    return
  }
  func.func @transform_0(%arg0: i32, %arg1: i32) -> (i32, i32) {
    %c0_i32 = arith.constant 0 : i32
    %c0_i32_0 = arith.constant 0 : i32
    return %arg0, %c0_i32 : i32, i32
  }
  func.func @transform_1(%arg0: i32, %arg1: i32) -> (i32, i32) {
    %c0_i32 = arith.constant 0 : i32
    %c0_i32_0 = arith.constant 0 : i32
    return %c0_i32, %arg1 : i32, i32
  }
  func.func @transform_2(%arg0: i32, %arg1: i32) -> (i32, i32) {
    %c0_i32 = arith.constant 0 : i32
    %c0_i32_0 = arith.constant 0 : i32
    return %c0_i32, %arg1 : i32, i32
  }
  func.func @transform_3(%arg0: i32, %arg1: i32) -> (i32, i32) {
    %c0_i32 = arith.constant 0 : i32
    return %arg0, %arg1 : i32, i32
  }
  func.func @transform_4(%arg0: i32, %arg1: i32) -> (i32, i32) {
    %c0_i32 = arith.constant 0 : i32
    return %arg0, %arg1 : i32, i32
  }
}

module attributes {stable_mosaic.version = 11 : i64} {
  func.func @_conv_mm_kernel(%arg0: i32, %arg1: i32, %arg2: memref<32x256xbf16, #tpu.memory_space<vmem>>, %arg3: memref<256x128xbf16, #tpu.memory_space<vmem>>, %arg4: memref<1x128xf32, #tpu.memory_space<vmem>>, %arg5: memref<32x128xbf16, #tpu.memory_space<vmem>>, %arg6: memref<8x128xf32, #tpu.memory_space<vmem>>) attributes {dimension_semantics = [#tpu.dimension_semantics<parallel>, #tpu.dimension_semantics<parallel>], iteration_bounds = array<i64: 1, 1>, scalar_prefetch = 0 : i64, scratch_operands = 0 : i64, tpu.core_type = #tpu.core_type<tc>, window_params = [{transform_indices = @transform_0, window_bounds = array<i64: 32, 256>}, {transform_indices = @transform_1, window_bounds = array<i64: 256, 128>}, {transform_indices = @transform_2, window_bounds = array<i64: 1, 128>}, {transform_indices = @transform_3, window_bounds = array<i64: 32, 128>}, {transform_indices = @transform_4, window_bounds = array<i64: 8, 128>}]} {
    %c0 = arith.constant 0 : index
    %c0_0 = arith.constant 0 : index
    %0 = vector.load %arg2[%c0, %c0_0] : memref<32x256xbf16, #tpu.memory_space<vmem>>, vector<32x256xbf16>
    %c0_1 = arith.constant 0 : index
    %c0_2 = arith.constant 0 : index
    %1 = vector.load %arg3[%c0_1, %c0_2] : memref<256x128xbf16, #tpu.memory_space<vmem>>, vector<256x128xbf16>
    %cst = arith.constant dense<0.000000e+00> : vector<32x128xf32>
    %2 = tpu.matmul %0, %1, %cst {dimension_numbers = #tpu.dot_dimension_numbers<[1], [0], [0], [1], [0, 0, 1, 1], [], []>} : vector<32x256xbf16>, vector<256x128xbf16>, vector<32x128xf32> -> vector<32x128xf32>
    %c0_3 = arith.constant 0 : index
    %c0_4 = arith.constant 0 : index
    %3 = vector.load %arg4[%c0_3, %c0_4] : memref<1x128xf32, #tpu.memory_space<vmem>>, vector<1x128xf32>
    %4 = vector.broadcast %3 : vector<1x128xf32> to vector<32x128xf32>
    %5 = arith.addf %2, %4 : vector<32x128xf32>
    %cst_5 = arith.constant 0.000000e+00 : f32
    %6 = vector.broadcast %cst_5 : f32 to vector<8x128xf32>
    %c0_6 = arith.constant 0 : index
    %c0_7 = arith.constant 0 : index
    %7 = vector.load %arg6[%c0_6, %c0_7] : memref<8x128xf32, #tpu.memory_space<vmem>>, vector<8x128xf32>
    tpu.vector_store %arg6[%c0_6, %c0_7], %6 {strides = array<i32>} : memref<8x128xf32, #tpu.memory_space<vmem>>, vector<8x128xf32>,
    %cst_8 = arith.constant dense<0.000000e+00> : vector<128xf32>
    %8 = vector.multi_reduction <add>, %5, %cst_8 [0] : vector<32x128xf32> to vector<128xf32>
    %9 = vector.shape_cast %8 : vector<128xf32> to vector<1x128xf32>
    %c0_9 = arith.constant 0 : index
    %c0_10 = arith.constant 0 : index
    %10 = vector.load %arg6[%c0_9, %c0_10] : memref<8x128xf32, #tpu.memory_space<vmem>>, vector<1x128xf32>
    tpu.vector_store %arg6[%c0_9, %c0_10], %9 {strides = array<i32>} : memref<8x128xf32, #tpu.memory_space<vmem>>, vector<1x128xf32>,
    %11 = arith.mulf %5, %5 : vector<32x128xf32>
    %cst_11 = arith.constant dense<0.000000e+00> : vector<128xf32>
    %12 = vector.multi_reduction <add>, %11, %cst_11 [0] : vector<32x128xf32> to vector<128xf32>
    %13 = vector.shape_cast %12 : vector<128xf32> to vector<1x128xf32>
    %c1 = arith.constant 1 : index
    %c0_12 = arith.constant 0 : index
    %14 = vector.load %arg6[%c1, %c0_12] : memref<8x128xf32, #tpu.memory_space<vmem>>, vector<1x128xf32>
    tpu.vector_store %arg6[%c1, %c0_12], %13 {strides = array<i32>} : memref<8x128xf32, #tpu.memory_space<vmem>>, vector<1x128xf32>,
    %15 = arith.truncf %5 : vector<32x128xf32> to vector<32x128xbf16>
    %c0_13 = arith.constant 0 : index
    %c0_14 = arith.constant 0 : index
    %16 = vector.load %arg5[%c0_13, %c0_14] : memref<32x128xbf16, #tpu.memory_space<vmem>>, vector<32x128xbf16>
    tpu.vector_store %arg5[%c0_13, %c0_14], %15 {strides = array<i32>} : memref<32x128xbf16, #tpu.memory_space<vmem>>, vector<32x128xbf16>,
    return
  }
  func.func @transform_0(%arg0: i32, %arg1: i32) -> (i32, i32) {
    %c0_i32 = arith.constant 0 : i32
    %c0_i32_0 = arith.constant 0 : i32
    return %arg0, %c0_i32 : i32, i32
  }
  func.func @transform_1(%arg0: i32, %arg1: i32) -> (i32, i32) {
    %c0_i32 = arith.constant 0 : i32
    %c0_i32_0 = arith.constant 0 : i32
    return %c0_i32, %arg1 : i32, i32
  }
  func.func @transform_2(%arg0: i32, %arg1: i32) -> (i32, i32) {
    %c0_i32 = arith.constant 0 : i32
    %c0_i32_0 = arith.constant 0 : i32
    return %c0_i32, %arg1 : i32, i32
  }
  func.func @transform_3(%arg0: i32, %arg1: i32) -> (i32, i32) {
    %c0_i32 = arith.constant 0 : i32
    return %arg0, %arg1 : i32, i32
  }
  func.func @transform_4(%arg0: i32, %arg1: i32) -> (i32, i32) {
    %c0_i32 = arith.constant 0 : i32
    return %arg0, %arg1 : i32, i32
  }
}

module attributes {stable_mosaic.version = 11 : i64} {
  func.func @_conv_mm_kernel(%arg0: i32, %arg1: i32, %arg2: memref<24x512xbf16, #tpu.memory_space<vmem>>, %arg3: memref<512x128xbf16, #tpu.memory_space<vmem>>, %arg4: memref<1x128xf32, #tpu.memory_space<vmem>>, %arg5: memref<24x128xbf16, #tpu.memory_space<vmem>>, %arg6: memref<8x128xf32, #tpu.memory_space<vmem>>) attributes {dimension_semantics = [#tpu.dimension_semantics<parallel>, #tpu.dimension_semantics<parallel>], iteration_bounds = array<i64: 1, 1>, scalar_prefetch = 0 : i64, scratch_operands = 0 : i64, tpu.core_type = #tpu.core_type<tc>, window_params = [{transform_indices = @transform_0, window_bounds = array<i64: 24, 512>}, {transform_indices = @transform_1, window_bounds = array<i64: 512, 128>}, {transform_indices = @transform_2, window_bounds = array<i64: 1, 128>}, {transform_indices = @transform_3, window_bounds = array<i64: 24, 128>}, {transform_indices = @transform_4, window_bounds = array<i64: 8, 128>}]} {
    %c0 = arith.constant 0 : index
    %c0_0 = arith.constant 0 : index
    %0 = vector.load %arg2[%c0, %c0_0] : memref<24x512xbf16, #tpu.memory_space<vmem>>, vector<24x512xbf16>
    %c0_1 = arith.constant 0 : index
    %c0_2 = arith.constant 0 : index
    %1 = vector.load %arg3[%c0_1, %c0_2] : memref<512x128xbf16, #tpu.memory_space<vmem>>, vector<512x128xbf16>
    %cst = arith.constant dense<0.000000e+00> : vector<24x128xf32>
    %2 = tpu.matmul %0, %1, %cst {dimension_numbers = #tpu.dot_dimension_numbers<[1], [0], [0], [1], [0, 0, 1, 1], [], []>} : vector<24x512xbf16>, vector<512x128xbf16>, vector<24x128xf32> -> vector<24x128xf32>
    %c0_3 = arith.constant 0 : index
    %c0_4 = arith.constant 0 : index
    %3 = vector.load %arg4[%c0_3, %c0_4] : memref<1x128xf32, #tpu.memory_space<vmem>>, vector<1x128xf32>
    %4 = vector.broadcast %3 : vector<1x128xf32> to vector<24x128xf32>
    %5 = arith.addf %2, %4 : vector<24x128xf32>
    %6 = tpu.iota {dimensions = array<i32: 0>} : vector<24x128xi32>
    %c24_i32 = arith.constant 24 : i32
    %7 = arith.muli %arg0, %c24_i32 : i32
    %8 = vector.broadcast %7 : i32 to vector<24x128xi32>
    %9 = arith.addi %6, %8 : vector<24x128xi32>
    %c18_i32 = arith.constant 18 : i32
    %10 = vector.broadcast %c18_i32 : i32 to vector<24x128xi32>
    %11 = arith.cmpi slt, %9, %10 : vector<24x128xi32>
    %cst_5 = arith.constant 0.000000e+00 : f32
    %12 = vector.broadcast %cst_5 : f32 to vector<24x128xf32>
    %13 = arith.select %11, %5, %12 : vector<24x128xi1>, vector<24x128xf32>
    %cst_6 = arith.constant 0.000000e+00 : f32
    %14 = vector.broadcast %cst_6 : f32 to vector<8x128xf32>
    %c0_7 = arith.constant 0 : index
    %c0_8 = arith.constant 0 : index
    %15 = vector.load %arg6[%c0_7, %c0_8] : memref<8x128xf32, #tpu.memory_space<vmem>>, vector<8x128xf32>
    tpu.vector_store %arg6[%c0_7, %c0_8], %14 {strides = array<i32>} : memref<8x128xf32, #tpu.memory_space<vmem>>, vector<8x128xf32>,
    %cst_9 = arith.constant dense<0.000000e+00> : vector<128xf32>
    %16 = vector.multi_reduction <add>, %13, %cst_9 [0] : vector<24x128xf32> to vector<128xf32>
    %17 = vector.shape_cast %16 : vector<128xf32> to vector<1x128xf32>
    %c0_10 = arith.constant 0 : index
    %c0_11 = arith.constant 0 : index
    %18 = vector.load %arg6[%c0_10, %c0_11] : memref<8x128xf32, #tpu.memory_space<vmem>>, vector<1x128xf32>
    tpu.vector_store %arg6[%c0_10, %c0_11], %17 {strides = array<i32>} : memref<8x128xf32, #tpu.memory_space<vmem>>, vector<1x128xf32>,
    %19 = arith.mulf %13, %13 : vector<24x128xf32>
    %cst_12 = arith.constant dense<0.000000e+00> : vector<128xf32>
    %20 = vector.multi_reduction <add>, %19, %cst_12 [0] : vector<24x128xf32> to vector<128xf32>
    %21 = vector.shape_cast %20 : vector<128xf32> to vector<1x128xf32>
    %c1 = arith.constant 1 : index
    %c0_13 = arith.constant 0 : index
    %22 = vector.load %arg6[%c1, %c0_13] : memref<8x128xf32, #tpu.memory_space<vmem>>, vector<1x128xf32>
    tpu.vector_store %arg6[%c1, %c0_13], %21 {strides = array<i32>} : memref<8x128xf32, #tpu.memory_space<vmem>>, vector<1x128xf32>,
    %23 = arith.truncf %5 : vector<24x128xf32> to vector<24x128xbf16>
    %c0_14 = arith.constant 0 : index
    %c0_15 = arith.constant 0 : index
    %24 = vector.load %arg5[%c0_14, %c0_15] : memref<24x128xbf16, #tpu.memory_space<vmem>>, vector<24x128xbf16>
    tpu.vector_store %arg5[%c0_14, %c0_15], %23 {strides = array<i32>} : memref<24x128xbf16, #tpu.memory_space<vmem>>, vector<24x128xbf16>,
    return
  }
  func.func @transform_0(%arg0: i32, %arg1: i32) -> (i32, i32) {
    %c0_i32 = arith.constant 0 : i32
    %c0_i32_0 = arith.constant 0 : i32
    return %arg0, %c0_i32 : i32, i32
  }
  func.func @transform_1(%arg0: i32, %arg1: i32) -> (i32, i32) {
    %c0_i32 = arith.constant 0 : i32
    %c0_i32_0 = arith.constant 0 : i32
    return %c0_i32, %arg1 : i32, i32
  }
  func.func @transform_2(%arg0: i32, %arg1: i32) -> (i32, i32) {
    %c0_i32 = arith.constant 0 : i32
    %c0_i32_0 = arith.constant 0 : i32
    return %c0_i32, %arg1 : i32, i32
  }
  func.func @transform_3(%arg0: i32, %arg1: i32) -> (i32, i32) {
    %c0_i32 = arith.constant 0 : i32
    return %arg0, %arg1 : i32, i32
  }
  func.func @transform_4(%arg0: i32, %arg1: i32) -> (i32, i32) {
    %c0_i32 = arith.constant 0 : i32
    return %arg0, %arg1 : i32, i32
  }
}

module attributes {stable_mosaic.version = 11 : i64} {
  func.func @_conv_mm_kernel(%arg0: i32, %arg1: i32, %arg2: memref<8x1024xbf16, #tpu.memory_space<vmem>>, %arg3: memref<1024x128xbf16, #tpu.memory_space<vmem>>, %arg4: memref<1x128xf32, #tpu.memory_space<vmem>>, %arg5: memref<8x128xf32, #tpu.memory_space<vmem>>, %arg6: memref<8x128xf32, #tpu.memory_space<vmem>>) attributes {dimension_semantics = [#tpu.dimension_semantics<parallel>, #tpu.dimension_semantics<parallel>], iteration_bounds = array<i64: 1, 1>, scalar_prefetch = 0 : i64, scratch_operands = 0 : i64, tpu.core_type = #tpu.core_type<tc>, window_params = [{transform_indices = @transform_0, window_bounds = array<i64: 8, 1024>}, {transform_indices = @transform_1, window_bounds = array<i64: 1024, 128>}, {transform_indices = @transform_2, window_bounds = array<i64: 1, 128>}, {transform_indices = @transform_3, window_bounds = array<i64: 8, 128>}, {transform_indices = @transform_4, window_bounds = array<i64: 8, 128>}]} {
    %c0 = arith.constant 0 : index
    %c0_0 = arith.constant 0 : index
    %0 = vector.load %arg2[%c0, %c0_0] : memref<8x1024xbf16, #tpu.memory_space<vmem>>, vector<8x1024xbf16>
    %c0_1 = arith.constant 0 : index
    %c0_2 = arith.constant 0 : index
    %1 = vector.load %arg3[%c0_1, %c0_2] : memref<1024x128xbf16, #tpu.memory_space<vmem>>, vector<1024x128xbf16>
    %cst = arith.constant dense<0.000000e+00> : vector<8x128xf32>
    %2 = tpu.matmul %0, %1, %cst {dimension_numbers = #tpu.dot_dimension_numbers<[1], [0], [0], [1], [0, 0, 1, 1], [], []>} : vector<8x1024xbf16>, vector<1024x128xbf16>, vector<8x128xf32> -> vector<8x128xf32>
    %c0_3 = arith.constant 0 : index
    %c0_4 = arith.constant 0 : index
    %3 = vector.load %arg4[%c0_3, %c0_4] : memref<1x128xf32, #tpu.memory_space<vmem>>, vector<1x128xf32>
    %4 = vector.broadcast %3 : vector<1x128xf32> to vector<8x128xf32>
    %5 = arith.addf %2, %4 : vector<8x128xf32>
    %cst_5 = arith.constant 0.000000e+00 : f32
    %6 = vector.broadcast %cst_5 : f32 to vector<8x128xf32>
    %c0_6 = arith.constant 0 : index
    %c0_7 = arith.constant 0 : index
    %7 = vector.load %arg6[%c0_6, %c0_7] : memref<8x128xf32, #tpu.memory_space<vmem>>, vector<8x128xf32>
    tpu.vector_store %arg6[%c0_6, %c0_7], %6 {strides = array<i32>} : memref<8x128xf32, #tpu.memory_space<vmem>>, vector<8x128xf32>,
    %cst_8 = arith.constant dense<0.000000e+00> : vector<128xf32>
    %8 = vector.multi_reduction <add>, %5, %cst_8 [0] : vector<8x128xf32> to vector<128xf32>
    %9 = vector.shape_cast %8 : vector<128xf32> to vector<1x128xf32>
    %c0_9 = arith.constant 0 : index
    %c0_10 = arith.constant 0 : index
    %10 = vector.load %arg6[%c0_9, %c0_10] : memref<8x128xf32, #tpu.memory_space<vmem>>, vector<1x128xf32>
    tpu.vector_store %arg6[%c0_9, %c0_10], %9 {strides = array<i32>} : memref<8x128xf32, #tpu.memory_space<vmem>>, vector<1x128xf32>,
    %11 = arith.mulf %5, %5 : vector<8x128xf32>
    %cst_11 = arith.constant dense<0.000000e+00> : vector<128xf32>
    %12 = vector.multi_reduction <add>, %11, %cst_11 [0] : vector<8x128xf32> to vector<128xf32>
    %13 = vector.shape_cast %12 : vector<128xf32> to vector<1x128xf32>
    %c1 = arith.constant 1 : index
    %c0_12 = arith.constant 0 : index
    %14 = vector.load %arg6[%c1, %c0_12] : memref<8x128xf32, #tpu.memory_space<vmem>>, vector<1x128xf32>
    tpu.vector_store %arg6[%c1, %c0_12], %13 {strides = array<i32>} : memref<8x128xf32, #tpu.memory_space<vmem>>, vector<1x128xf32>,
    %cst_13 = arith.constant 0.000000e+00 : f32
    %15 = vector.broadcast %cst_13 : f32 to vector<8x128xf32>
    %16 = arith.subf %15, %5 : vector<8x128xf32>
    %17 = math.exp %16 : vector<8x128xf32>
    %cst_14 = arith.constant 1.000000e+00 : f32
    %18 = vector.broadcast %cst_14 : f32 to vector<8x128xf32>
    %19 = arith.addf %18, %17 : vector<8x128xf32>
    %20 = tpu.reciprocal %19 {approx = true} : vector<8x128xf32> -> vector<8x128xf32>
    %c0_15 = arith.constant 0 : index
    %c0_16 = arith.constant 0 : index
    %21 = vector.load %arg5[%c0_15, %c0_16] : memref<8x128xf32, #tpu.memory_space<vmem>>, vector<8x128xf32>
    tpu.vector_store %arg5[%c0_15, %c0_16], %20 {strides = array<i32>} : memref<8x128xf32, #tpu.memory_space<vmem>>, vector<8x128xf32>,
    return
  }
  func.func @transform_0(%arg0: i32, %arg1: i32) -> (i32, i32) {
    %c0_i32 = arith.constant 0 : i32
    %c0_i32_0 = arith.constant 0 : i32
    return %arg0, %c0_i32 : i32, i32
  }
  func.func @transform_1(%arg0: i32, %arg1: i32) -> (i32, i32) {
    %c0_i32 = arith.constant 0 : i32
    %c0_i32_0 = arith.constant 0 : i32
    return %c0_i32, %arg1 : i32, i32
  }
  func.func @transform_2(%arg0: i32, %arg1: i32) -> (i32, i32) {
    %c0_i32 = arith.constant 0 : i32
    %c0_i32_0 = arith.constant 0 : i32
    return %c0_i32, %arg1 : i32, i32
  }
  func.func @transform_3(%arg0: i32, %arg1: i32) -> (i32, i32) {
    %c0_i32 = arith.constant 0 : i32
    return %arg0, %arg1 : i32, i32
  }
  func.func @transform_4(%arg0: i32, %arg1: i32) -> (i32, i32) {
    %c0_i32 = arith.constant 0 : i32
    return %arg0, %arg1 : i32, i32
  }
}

</mosaic_0001>

<bundles_post_ra>
// kernel: discriminator_forward.5
= control target key start
LH: loop header
LB: loop body
LE: loop exit
PB: predicated region body
PF: predicated region fallthrough
CT: control target
= control target key end

     0   :  { %10 = vsyncpa [#allocation3], 0  ;;  %s1821_s0 = inlined_call_operand.vmem [shape: bf16[512,128], index: 0, kind: input, shape index: {}]   ;;  %s1822_s1 = inlined_call_operand.vmem [shape: bf16[128,128], index: 1, kind: input, shape index: {}]   ;;  %s1823_s2 = inlined_call_operand.vmem [shape: f32[1,128], index: 2, kind: input, shape index: {}]   ;;  %s1824_s3 = inlined_call_operand.vmem [shape: bf16[512,128], index: 3, kind: output, shape index: {0}]   ;;  %s1825_s4 = inlined_call_operand.hbm [shape: f32[16,128], index: 4, kind: output, shape index: {1}]  }
   0x1   :  { %12 = vsyncpa [#allocation3 + $0x1], 0  ;;  %s1522_s15 = smov 0   ;;  %s1524_s16 = smov 0  }
   0x2   :  { %s1526_s17 = smov 0   ;;  %s1528_s18 = smov 0  }
   0x3   :  { %s1530_s19 = smov 0   ;;  %s1532_s20 = smov 0  }
   0x4 LB: > { %s1049_s21 = sadd.s32 4294967295, %s1493_s20   ;;  %s1050_s22 = sadd.s32 4294967294, %s1493_s20   ;;  %s1493_s20 = sphi %s1532_s20, %s18_s20   ;;  %s1489_s19 = sphi %s1530_s19, %s1832_s19   ;;  %s1485_s18 = sphi %s1528_s18, %s1831_s18   ;;  %s1481_s17 = sphi %s1526_s17, %s1830_s17   ;;  %s1477_s16 = sphi %s1524_s16, %s1829_s16   ;;  %s1473_s15 = sphi %s1522_s15, %s1828_s15  }
   0x5   : > { %s30_s23 = sadd.s32 1, %s1489_s19  ;;  %s145_s24 = sadd.s32 1, %s1481_s17 }
   0x6   : > { %p32_p0 = scmp.ge.s32.totalorder %s30_s23, 2  ;;  %p155_p1 = scmp.ne.s32.totalorder %s1481_s17, %s1477_s16 }
   0x7   : > { %p156_p2 = scmp.eq.s32.totalorder %s1049_s21, 1  ;;  %p161_p3 = scmp.ne.s32.totalorder %s1477_s16, %s1473_s15 }
   0x8   : > { %s1834_s23 = smov (%p32_p0, %s30_s23), 0  ;;  %p162_p5 = scmp.eq.s32.totalorder %s1050_s22, 1 }
   0x9   : > { %p1562_p4 = por %p156_p2, %p155_p1  ;;  %s140_s26 = ssub.s32 %s1489_s19, %s1834_s23 }
   0xa   : > { %p1055_p6 = scmp.ge.s32.totalorder %s1493_s20, 1  ;;  %p143_p7 = scmp.eq.s32.totalorder %s140_s26, 0 }
   0xb   : > { %p1569_p8 = por %p162_p5, %p161_p3  ;;  %p202_p9 = scmp.lt.s32.totalorder %s1493_s20, 3 }
   0xc   : > { %s1575_s28 = scalar_select %p143_p7, %s1481_s17, %s145_s24  }
   0xd   : > { %p203_p10 = pnand %p1055_p6, %p202_p9 }
   0xe   : > { %s1057_s5 = sshll.u32 (!%p203_p10), %s1485_s18, 5  ;;  %s240_s9 = sand.u32 (!%p203_p10), 1, %s1477_s16  }
   0xf   : > { %206 = sbr.rel (%p203_p10) target bundleno = 343 (0x157), region = 32  ;;  %p244_p11 = scmp.lt.s32.totalorder (!%p203_p10), %s1057_s5, 63 }
  0x10   : > { %s1056_s11 = sshll.u32 (!%p203_p10), %s240_s9, 3  ;;  %s904_s6 = scalar_lea.sflag (!%p203_p10), [#allocation3], %s240_s9 }
  0x11   : > { %s1631_s12 = scalar_lea.vmem (!%p203_p10), [#allocation2], %s1056_s11  ;;  %s1496_s8 = smov (!%p203_p10), [#allocation2]  }
  0x14   : > { %v1393_v0 = vld [vmem:[%s1822_s1 + $0x38] sm:$0xff]   ;;  %v1394_v1 = vld [vmem:[%s1822_s1 + $0x30] sm:$0xff]   ;;  %s1836_s5 = smov (!%p244_p11, %s1057_s5), 63  ;;  %v1395_v2 = vld [vmem:[%s1822_s1 + $0x28] sm:$0xff]   ;;  %v1495_v24 = vmov 0.0  }
  0x15   : > { %1273 = vmatprep.subr.bf16.mxu0 %v1393_v0  ;;  %1321 = vmatprep.subr.bf16.mxu1 %v1393_v0  ;;  %s1058_s10 = sshll.u32 %s1836_s5, 2  ;;  %v1396_v3 = vld [vmem:[%s1822_s1 + $0x20] sm:$0xff]   ;;  %v1397_v5 = vld [vmem:[%s1822_s1 + $0x18] sm:$0xff]   ;;  %v1398_v6 = vld [vmem:[%s1822_s1 + $0x10] sm:$0xff]   ;;  %626 = vst [vmem:[%s1631_s12] sm:$0xff] %v1495_v24  ;;  %s1119_s5 = sshll.u32 %s1485_s18, 7 }
  0x16   : > { %1274 = vmatpush3.bf16.msra.mxu0 %v1393_v0  ;;  %1329 = vmatpush3.bf16.msra.mxu1 %v1393_v0  ;;  %s1595_s13 = scalar_lea.vmem %s1821_s0, %s1058_s10  ;;  %v1399_v8 = vld [vmem:[%s1822_s1 + $0x8] sm:$0xff]   ;;  %v1400_v9 = vld [vmem:[%s1822_s1] sm:$0xff]   ;;  %s1653_s24 = scalar_lea.vmem %s1824_s3, %s1058_s10 }
  0x17   : > { %1275 = vmatprep.subr.bf16.mxu0 %v1394_v1  ;;  %1322 = vmatprep.subr.bf16.mxu1 %v1394_v1  ;;  %v1401_v4 = vld [vmem:[%s1595_s13] sm:$0xff]   ;;  %v1402_v10 = vld [vmem:[%s1595_s13 + $0x8] sm:$0xff]   ;;  %v1403_v12 = vld [vmem:[%s1595_s13 + $0x10] sm:$0xff]   ;;  %s922_s10 = sshll.u32 %s1631_s12, 4  ;;  %s920_s30 = scalar_lea.hbm %s1825_s4, %s1119_s5  ;;  %s923_s10 = int_to_ptr.vmem [resolvable:$true] %s922_s10 }
  0x18   : > { %1289 = vmatprep.mubr.bf16.mxu0 %v1401_v4  ;;  %v1409_v7 = vld [vmem:[%s1595_s13 + $0x40] sm:$0xff]   ;;  %v1410_v11 = vld [vmem:[%s1595_s13 + $0x48] sm:$0xff]   ;;  %v1411_v13 = vld [vmem:[%s1595_s13 + $0x50] sm:$0xff]   ;;  %s1417_s7 = scalar_lea.vmem %s923_s10, 128  ;;  %s1421_s18 = sshll.u32 %s1496_s8, 4  ;;  %s1422_s18 = int_to_ptr.vmem [resolvable:$false] %s1421_s18 }
  0x19   : > { %1305 = vmatprep.mubr.bf16.mxu1 %v1409_v7  ;;  %v1404_v14 = vld [vmem:[%s1595_s13 + $0x18] sm:$0xff]   ;;  %v1405_v16 = vld [vmem:[%s1595_s13 + $0x20] sm:$0xff]   ;;  %v1406_v18 = vld [vmem:[%s1595_s13 + $0x28] sm:$0xff]   ;;  %p1418_p12 = scmp.ne.s32.totalorder %s923_s10, %s1417_s7  ;;  %s1423_s11 = scalar_lea.vmem %s1422_s18, 256 }
  0x1a   : > { %1276 = vmatpush3.bf16.msra.mxu0 %v1394_v1  ;;  %1330 = vmatpush3.bf16.msra.mxu1 %v1394_v1  ;;  %v1412_v15 = vld [vmem:[%s1595_s13 + $0x58] sm:$0xff]   ;;  %v1413_v17 = vld [vmem:[%s1595_s13 + $0x60] sm:$0xff]   ;;  %v1414_v19 = vld [vmem:[%s1595_s13 + $0x68] sm:$0xff]   ;;  %p1424_p1 = scmp.lt.s32.totalorder %s923_s10, %s1422_s18  ;;  %p1425_p2 = scmp.lt.s32.totalorder %s1423_s11, %s1417_s7 }
  0x1b   : > { %1277 = vmatprep.subr.bf16.mxu0 %v1395_v2  ;;  %1323 = vmatprep.subr.bf16.mxu1 %v1395_v2  ;;  %v1407_v20 = vld [vmem:[%s1595_s13 + $0x30] sm:$0xff]   ;;  %v1408_v22 = vld [vmem:[%s1595_s13 + $0x38] sm:$0xff]   ;;  %v1637_v27 = vld [vmem:[%s1823_s2] ss:$0 sm:$0xff]  ;;  %p1419_p13 = pnand %p1418_p12, %p1562_p4 }
  0x1c   : > { %v1415_v21 = vld [vmem:[%s1595_s13 + $0x70] sm:$0xff]   ;;  %v1416_v23 = vld [vmem:[%s1595_s13 + $0x78] sm:$0xff]   ;;  %p1426_p3 = por %p1425_p2, %p1424_p1 }
  0x1d   : > { %p1420_p0 = pneg %p1419_p13 }
  0x1e   : > { %1278 = vmatpush3.bf16.msra.mxu0 %v1395_v2  ;;  %1331 = vmatpush3.bf16.msra.mxu1 %v1395_v2 }
  0x1f   : > { %1279 = vmatprep.subr.bf16.mxu0 %v1396_v3  ;;  %1324 = vmatprep.subr.bf16.mxu1 %v1396_v3  ;;  %p1427_p5 = pnand %p1426_p3, %p1420_p0 }
  0x22   : > { %1280 = vmatpush3.bf16.msra.mxu0 %v1396_v3  ;;  %1332 = vmatpush3.bf16.msra.mxu1 %v1396_v3 }
  0x23   : > { %1281 = vmatprep.subr.bf16.mxu0 %v1397_v5  ;;  %1325 = vmatprep.subr.bf16.mxu1 %v1397_v5 }
  0x26   : > { %1282 = vmatpush3.bf16.msra.mxu0 %v1397_v5  ;;  %1333 = vmatpush3.bf16.msra.mxu1 %v1397_v5 }
  0x27   : > { %1283 = vmatprep.subr.bf16.mxu0 %v1398_v6  ;;  %1326 = vmatprep.subr.bf16.mxu1 %v1398_v6 }
  0x2a   : > { %1284 = vmatpush3.bf16.msra.mxu0 %v1398_v6  ;;  %1334 = vmatpush3.bf16.msra.mxu1 %v1398_v6 }
  0x2b   : > { %1285 = vmatprep.subr.bf16.mxu0 %v1399_v8  ;;  %1327 = vmatprep.subr.bf16.mxu1 %v1399_v8 }
  0x2e   : > { %1286 = vmatpush3.bf16.msra.mxu0 %v1399_v8  ;;  %1335 = vmatpush3.bf16.msra.mxu1 %v1399_v8 }
  0x2f   : > { %1287 = vmatprep.subr.bf16.mxu0 %v1400_v9  ;;  %1328 = vmatprep.subr.bf16.mxu1 %v1400_v9 }
  0x32   : > { %1288 = vmatpush3.bf16.msra.mxu0 %v1400_v9  ;;  %1336 = vmatpush3.bf16.msra.mxu1 %v1400_v9 }
  0x35   : > { %1290 = vmatmul.mubr.bf16.vlgmr.msra.gmra.mxu0 %v1402_v10  ;;  %1306 = vmatmul.mubr.bf16.vlgmr.msra.gmra.mxu1 %v1410_v11 }
  0x36   : > { %1293 = vmatprep.mubr.bf16.mxu0 %v1403_v12  ;;  %1309 = vmatprep.mubr.bf16.mxu1 %v1411_v13 }
  0x3d   : > { %1294 = vmatmul.mubr.bf16.gmra.mxu0 %v1404_v14  ;;  %1310 = vmatmul.mubr.bf16.gmra.mxu1 %v1412_v15 }
  0x3e   : > { %1297 = vmatprep.mubr.bf16.mxu0 %v1405_v16  ;;  %1313 = vmatprep.mubr.bf16.mxu1 %v1413_v17 }
  0x45   : > { %1298 = vmatmul.mubr.bf16.gmra.mxu0 %v1406_v18  ;;  %1314 = vmatmul.mubr.bf16.gmra.mxu1 %v1414_v19 }
  0x46   : > { %1301 = vmatprep.mubr.bf16.mxu0 %v1407_v20  ;;  %1317 = vmatprep.mubr.bf16.mxu1 %v1415_v21 }
  0x4d   : > { %1302 = vmatmul.mubr.bf16.gmra.mxu0 %v1408_v22  ;;  %1318 = vmatmul.mubr.bf16.gmra.mxu1 %v1416_v23 }
  0xf5   : > { %v1291_v25 = vpop.f32.mrf.mxu0  ;;  %v1307_v26 = vpop.f32.mrf.mxu1 }
  0xf6   : > { %v1640_v31 = vadd.f32 %v1307_v26, %v1637_v27  ;;  %v508_v33 = vadd.f32 %v1291_v25, %v1637_v27 }
  0xf7   : > { %v499_v28 = vpop.f32.mrf.mxu0  ;;  %v563_v29 = vpop.f32.mrf.mxu1 }
  0xf8   : > { %v500_v34 = vadd.f32 %v1637_v27, %v499_v28  ;;  %v1656_v38 = vadd.f32 %v1637_v27, %v563_v29  ;;  %v667_v53 = vmul.f32 %v508_v33, %v508_v33 }
  0xf9   : > { %v1292_v30 = vpop.f32.mrf.mxu0  ;;  %v1308_v32 = vpop.f32.mrf.mxu1 }
  0xfa   : > { %v511_v35 = vadd.f32 %v1292_v30, %v1637_v27  ;;  %v1646_v36 = vadd.f32 %v1308_v32, %v1637_v27  ;;  %v665_v46 = vmul.f32 %v500_v34, %v500_v34 }
  0xfb   : > { %v502_v37 = vpop.f32.mrf.mxu0  ;;  %v566_v39 = vpop.f32.mrf.mxu1 }
  0xfc   : > { %v1162_v40 = vpack.c.bf16 %v511_v35, %v508_v33  ;;  %v503_v41 = vadd.f32 %v1637_v27, %v502_v37  ;;  %v1202_v43 = vpack.c.bf16 %v1646_v36, %v1640_v31  ;;  %v1662_v44 = vadd.f32 %v1637_v27, %v566_v39 }
  0xfd   : > { %v1295_v42 = vpop.f32.mrf.mxu0  ;;  %v1311_v45 = vpop.f32.mrf.mxu1  ;;  %v668_v57 = vmul.f32 %v511_v35, %v511_v35 }
  0xfe   : > { %1234 = vst [vmem:[%s1653_s24 + $0x8] sm:$0xff] %v1162_v40   ;;  %v627_v47 = vadd.f32 %v503_v41, %v500_v34  ;;  %v666_v48 = vmul.f32 %v503_v41, %v503_v41  ;;  %v1157_v49 = vpack.c.bf16 %v503_v41, %v500_v34  ;;  %1242 = vst [vmem:[%s1653_s24 + $0x48] sm:$0xff] %v1202_v43  }
  0xff   : > { %v515_v50 = vpop.f32.mrf.mxu0  ;;  %v1197_v51 = vpack.c.bf16 %v1662_v44, %v1656_v38  ;;  %v579_v52 = vpop.f32.mrf.mxu1  ;;  %v1672_v59 = vadd.f32 %v1311_v45, %v1637_v27  ;;  %v524_v62 = vadd.f32 %v1295_v42, %v1637_v27 }
 0x100   : > { %v628_v54 = vadd.f32 %v627_v47, %v508_v33  ;;  %v697_v55 = vadd.f32 %v666_v48, %v665_v46  ;;  %1158 = vst [vmem:[%s1653_s24] sm:$0xff] %v1157_v49   ;;  %v516_v56 = vadd.f32 %v1637_v27, %v515_v50  ;;  %v1677_v2 = vadd.f32 %v1637_v27, %v579_v52 }
 0x101   : > { %v1296_v58 = vpop.f32.mrf.mxu0  ;;  %1241 = vst [vmem:[%s1653_s24 + $0x40] sm:$0xff] %v1197_v51   ;;  %v1312_v60 = vpop.f32.mrf.mxu1  ;;  %v671_v22 = vmul.f32 %v524_v62, %v524_v62 }
 0x102   : > { %v698_v61 = vadd.f32 %v697_v55, %v667_v53  ;;  %v629_v63 = vadd.f32 %v628_v54, %v511_v35  ;;  %v527_v0 = vadd.f32 %v1296_v58, %v1637_v27  ;;  %v1680_v3 = vadd.f32 %v1312_v60, %v1637_v27 }
 0x103   : > { %v518_v1 = vpop.f32.mrf.mxu0  ;;  %v582_v4 = vpop.f32.mrf.mxu1  ;;  %v669_v6 = vmul.f32 %v516_v56, %v516_v56 }
 0x104   : > { %v630_v5 = vadd.f32 %v629_v63, %v516_v56  ;;  %v699_v7 = vadd.f32 %v698_v61, %v668_v57  ;;  %v1172_v8 = vpack.c.bf16 %v527_v0, %v524_v62  ;;  %v519_v9 = vadd.f32 %v1637_v27, %v518_v1 }
 0x105   : > { %v1299_v10 = vpop.f32.mrf.mxu0  ;;  %v1212_v11 = vpack.c.bf16 %v1680_v3, %v1672_v59  ;;  %v1686_v12 = vadd.f32 %v1637_v27, %v582_v4  ;;  %v1315_v13 = vpop.f32.mrf.mxu1  ;;  %v672_v33 = vmul.f32 %v527_v0, %v527_v0 }
 0x106   : > { %v700_v14 = vadd.f32 %v699_v7, %v669_v6  ;;  %1236 = vst [vmem:[%s1653_s24 + $0x18] sm:$0xff] %v1172_v8   ;;  %v631_v15 = vadd.f32 %v630_v5, %v519_v9  ;;  %v670_v16 = vmul.f32 %v519_v9, %v519_v9  ;;  %v1167_v17 = vpack.c.bf16 %v519_v9, %v516_v56 }
 0x107   : > { %v531_v18 = vpop.f32.mrf.mxu0  ;;  %1244 = vst [vmem:[%s1653_s24 + $0x58] sm:$0xff] %v1212_v11   ;;  %v595_v19 = vpop.f32.mrf.mxu1  ;;  %v1207_v21 = vpack.c.bf16 %v1686_v12, %v1677_v2  ;;  %v1695_v26 = vadd.f32 %v1315_v13, %v1637_v27  ;;  %v540_v29 = vadd.f32 %v1299_v10, %v1637_v27 }
 0x108   : > { %v532_v20 = vadd.f32 %v1637_v27, %v531_v18  ;;  %v632_v23 = vadd.f32 %v631_v15, %v524_v62  ;;  %v701_v24 = vadd.f32 %v700_v14, %v670_v16  ;;  %1235 = vst [vmem:[%s1653_s24 + $0x10] sm:$0xff] %v1167_v17   ;;  %v1704_v39 = vadd.f32 %v1637_v27, %v595_v19 }
 0x109   : > { %v1300_v25 = vpop.f32.mrf.mxu0  ;;  %v1316_v28 = vpop.f32.mrf.mxu1  ;;  %1243 = vst [vmem:[%s1653_s24 + $0x50] sm:$0xff] %v1207_v21   ;;  %v675_v60 = vmul.f32 %v540_v29, %v540_v29 }
 0x10a   : > { %v543_v30 = vadd.f32 %v1300_v25, %v1637_v27  ;;  %v1701_v32 = vadd.f32 %v1316_v28, %v1637_v27  ;;  %v702_v34 = vadd.f32 %v701_v24, %v671_v22  ;;  %v633_v35 = vadd.f32 %v632_v23, %v527_v0 }
 0x10b   : > { %v534_v37 = vpop.f32.mrf.mxu0  ;;  %v598_v40 = vpop.f32.mrf.mxu1  ;;  %v673_v41 = vmul.f32 %v532_v20, %v532_v20 }
 0x10c   : > { %v1182_v42 = vpack.c.bf16 %v543_v30, %v540_v29  ;;  %v535_v43 = vadd.f32 %v1637_v27, %v534_v37  ;;  %v634_v45 = vadd.f32 %v633_v35, %v532_v20  ;;  %v703_v46 = vadd.f32 %v702_v34, %v672_v33 }
 0x10d   : > { %v1303_v47 = vpop.f32.mrf.mxu0  ;;  %v1222_v48 = vpack.c.bf16 %v1701_v32, %v1695_v26  ;;  %v1710_v49 = vadd.f32 %v1637_v27, %v598_v40  ;;  %v1319_v50 = vpop.f32.mrf.mxu1  ;;  %v676_v7 = vmul.f32 %v543_v30, %v543_v30  ;;  %v681_v37 = vmul.f32 %v1656_v38, %v1656_v38 }
 0x10e   : > { %1238 = vst [vmem:[%s1653_s24 + $0x28] sm:$0xff] %v1182_v42   ;;  %v674_v51 = vmul.f32 %v535_v43, %v535_v43  ;;  %v1177_v52 = vpack.c.bf16 %v535_v43, %v532_v20  ;;  %v704_v53 = vadd.f32 %v703_v46, %v673_v41  ;;  %v635_v54 = vadd.f32 %v634_v45, %v535_v43 }
 0x10f   : > { %v547_v55 = vpop.f32.mrf.mxu0  ;;  %1246 = vst [vmem:[%s1653_s24 + $0x68] sm:$0xff] %v1222_v48   ;;  %v1217_v56 = vpack.c.bf16 %v1710_v49, %v1704_v39  ;;  %v611_v57 = vpop.f32.mrf.mxu1  ;;  %v1720_v0 = vadd.f32 %v1319_v50, %v1637_v27  ;;  %v556_v4 = vadd.f32 %v1303_v47, %v1637_v27  ;;  %v682_v42 = vmul.f32 %v1662_v44, %v1662_v44 }
 0x110   : > { %1237 = vst [vmem:[%s1653_s24 + $0x20] sm:$0xff] %v1177_v52   ;;  %v548_v58 = vadd.f32 %v1637_v27, %v547_v55  ;;  %v636_v61 = vadd.f32 %v635_v54, %v540_v29  ;;  %v705_v62 = vadd.f32 %v704_v53, %v674_v51  ;;  %v612_v11 = vadd.f32 %v1637_v27, %v611_v57 }
 0x111   : > { %v1304_v63 = vpop.f32.mrf.mxu0  ;;  %1245 = vst [vmem:[%s1653_s24 + $0x60] sm:$0xff] %v1217_v56   ;;  %v1320_v1 = vpop.f32.mrf.mxu1  ;;  %v679_v28 = vmul.f32 %v556_v4, %v556_v4  ;;  %v683_v45 = vmul.f32 %v1640_v31, %v1640_v31  ;;  %v684_v48 = vmul.f32 %v1646_v36, %v1646_v36  ;;  %v685_v52 = vmul.f32 %v1677_v2, %v1677_v2 }
 0x112   : > { %v559_v5 = vadd.f32 %v1304_v63, %v1637_v27  ;;  %v1725_v6 = vadd.f32 %v1320_v1, %v1637_v27  ;;  %v706_v8 = vadd.f32 %v705_v62, %v675_v60  ;;  %v637_v9 = vadd.f32 %v636_v61, %v543_v30 }
 0x113   : > { %v550_v10 = vpop.f32.mrf.mxu0  ;;  %v614_v13 = vpop.f32.mrf.mxu1  ;;  %v677_v14 = vmul.f32 %v548_v58, %v548_v58  ;;  %v686_v55 = vmul.f32 %v1686_v12, %v1686_v12  ;;  %v689_v61 = vmul.f32 %v1704_v39, %v1704_v39  ;;  %v690_v1 = vmul.f32 %v1710_v49, %v1710_v49 }
 0x114   : > { %v1192_v15 = vpack.c.bf16 %v559_v5, %v556_v4  ;;  %v551_v16 = vadd.f32 %v1637_v27, %v550_v10  ;;  %v638_v17 = vadd.f32 %v637_v9, %v548_v58  ;;  %v707_v18 = vadd.f32 %v706_v8, %v676_v7 }
 0x115   : > { %v1232_v19 = vpack.c.bf16 %v1725_v6, %v1720_v0  ;;  %v615_v20 = vadd.f32 %v1637_v27, %v614_v13  ;;  %v680_v33 = vmul.f32 %v559_v5, %v559_v5  ;;  %v693_v9 = vmul.f32 %v612_v11, %v612_v11 }
 0x116   : > { %1240 = vst [vmem:[%s1653_s24 + $0x38] sm:$0xff] %v1192_v15   ;;  %v678_v21 = vmul.f32 %v551_v16, %v551_v16  ;;  %v1187_v22 = vpack.c.bf16 %v551_v16, %v548_v58  ;;  %v708_v23 = vadd.f32 %v707_v18, %v677_v14  ;;  %v639_v24 = vadd.f32 %v638_v17, %v551_v16 }
 0x117   : > { %1248 = vst [vmem:[%s1653_s24 + $0x78] sm:$0xff] %v1232_v19   ;;  %v1227_v25 = vpack.c.bf16 %v615_v20, %v612_v11  ;;  %v694_v15 = vmul.f32 %v615_v20, %v615_v20  ;;  %v696_v17 = vmul.f32 %v1725_v6, %v1725_v6 }
 0x118   : > { %1239 = vst [vmem:[%s1653_s24 + $0x30] sm:$0xff] %v1187_v22   ;;  %v640_v29 = vadd.f32 %v639_v24, %v556_v4  ;;  %v709_v30 = vadd.f32 %v708_v23, %v678_v21 }
 0x119   : > { %1247 = vst [vmem:[%s1653_s24 + $0x70] sm:$0xff] %v1227_v25  }
 0x11a   : > { %v710_v34 = vadd.f32 %v709_v30, %v679_v28  ;;  %v641_v35 = vadd.f32 %v640_v29, %v559_v5 }
 0x11c   : > { %v642_v27 = vadd.f32 %v641_v35, %v1656_v38  ;;  %v711_v40 = vadd.f32 %v710_v34, %v680_v33 }
 0x11e   : > { %v643_v41 = vadd.f32 %v642_v27, %v1662_v44  ;;  %v712_v43 = vadd.f32 %v711_v40, %v681_v37 }
 0x120   : > { %v644_v46 = vadd.f32 %v643_v41, %v1640_v31  ;;  %v713_v47 = vadd.f32 %v712_v43, %v682_v42  ;;  %v687_v31 = vmul.f32 %v1672_v59, %v1672_v59 }
 0x122   : > { %v714_v50 = vadd.f32 %v713_v47, %v683_v45  ;;  %v645_v51 = vadd.f32 %v644_v46, %v1646_v36  ;;  %v688_v36 = vmul.f32 %v1680_v3, %v1680_v3 }
 0x124   : > { %v646_v38 = vadd.f32 %v645_v51, %v1677_v2  ;;  %v715_v53 = vadd.f32 %v714_v50, %v684_v48 }
 0x126   : > { %v716_v44 = vadd.f32 %v715_v53, %v685_v52  ;;  %v647_v54 = vadd.f32 %v646_v38, %v1686_v12 }
 0x128   : > { %v648_v56 = vadd.f32 %v647_v54, %v1672_v59  ;;  %v717_v57 = vadd.f32 %v716_v44, %v686_v55  ;;  %v691_v59 = vmul.f32 %v1695_v26, %v1695_v26 }
 0x12a   : > { %v718_v58 = vadd.f32 %v717_v57, %v687_v31  ;;  %v649_v60 = vadd.f32 %v648_v56, %v1680_v3  ;;  %v692_v3 = vmul.f32 %v1701_v32, %v1701_v32 }
 0x12c   : > { %v650_v2 = vadd.f32 %v649_v60, %v1704_v39  ;;  %v719_v62 = vadd.f32 %v718_v58, %v688_v36 }
 0x12e   : > { %v720_v63 = vadd.f32 %v719_v62, %v689_v61  ;;  %v651_v12 = vadd.f32 %v650_v2, %v1710_v49  ;;  %v695_v49 = vmul.f32 %v1720_v0, %v1720_v0 }
 0x130   : > { %v652_v4 = vadd.f32 %v651_v12, %v1695_v26  ;;  %v721_v5 = vadd.f32 %v720_v63, %v690_v1 }
 0x132   : > { %v722_v7 = vadd.f32 %v721_v5, %v691_v59  ;;  %v653_v8 = vadd.f32 %v652_v4, %v1701_v32 }
 0x134   : > { %v654_v39 = vadd.f32 %v653_v8, %v612_v11  ;;  %v723_v10 = vadd.f32 %v722_v7, %v692_v3 }
 0x136   : > { %v724_v13 = vadd.f32 %v723_v10, %v693_v9  ;;  %v655_v14 = vadd.f32 %v654_v39, %v615_v20 }
 0x138   : > { %v656_v16 = vadd.f32 %v655_v14, %v1720_v0  ;;  %v725_v26 = vadd.f32 %v724_v13, %v694_v15 }
 0x13a   : > { %v657_v18 = vadd.f32 %v656_v16, %v1725_v6  ;;  %v726_v32 = vadd.f32 %v725_v26, %v695_v49 }
 0x13c   : > { %v658_v11 = vrot.slane %v657_v18, 4  ;;  %v727_v19 = vadd.f32 %v726_v32, %v696_v17 }
 0x13e   : > { %v659_v21 = vadd.f32 %v658_v11, %v657_v18  ;;  %v728_v20 = vrot.slane %v727_v19, 4 }
 0x140   : > { %v660_v22 = vrot.slane %v659_v21, 2  ;;  %v729_v23 = vadd.f32 %v728_v20, %v727_v19 }
 0x142   : > { %v661_v24 = vadd.f32 %v660_v22, %v659_v21  ;;  %v730_v0 = vrot.slane %v729_v23, 2 }
 0x144   : > { %v662_v25 = vrot.slane %v661_v24, 1  ;;  %v731_v28 = vadd.f32 %v730_v0, %v729_v23 }
 0x146   : > { %v663_v29 = vadd.f32 %v662_v25, %v661_v24  ;;  %v732_v30 = vrot.slane %v731_v28, 1 }
 0x148   : > { %664 = vst [vmem:[%s1631_s12] sm:$0x1] %v663_v29  ;;  %v733_v6 = vadd.f32 %v732_v30, %v731_v28 }
 0x14a   : > { %734 = vst [vmem:[%s1631_s12 + $0x1] sm:$0x1] %v733_v6 }
 0x14b   : > { %1430 = shalt.err (!%p1427_p5)
}
 0x14c   : > { %s1431_s14 = scalar_lea.hbm %s920_s30, 128  ;;  %s1435_s21 = scalar_lea.hbm %s1825_s4, 256 }
 0x14d   : > { %p1432_p6 = scmp.ne.s32.totalorder %s920_s30, %s1431_s14  ;;  %p1436_p10 = scmp.lt.s32.totalorder %s920_s30, %s1825_s4 }
 0x14e   : > { %p1437_p11 = scmp.lt.s32.totalorder %s1435_s21, %s1431_s14 }
 0x14f   : > { %p1433_p7 = pnand %p1432_p6, %p1562_p4 }
 0x150   : > { %p1438_p12 = por %p1437_p11, %p1436_p10 }
 0x151   : > { %p1434_p9 = pneg %p1433_p7 }
 0x153   : > { %p1439_p13 = pnand %p1438_p12, %p1434_p9 }
 0x155   : > { %1442 = shalt.err (!%p1439_p13)
}
 0x156   : > { %1337 = dma.vmem_to_hbm [thread:$0]  (%p1562_p4), %s923_s10, 128, %s920_s30, %s904_s6  }
 0x157 PF: > { %p1343_p0 = scmp.ge.s32.totalorder %s1493_s20, 2  ;;  %s945_s24 = sand.u32 1, %s1473_s15  }
 0x158   : > { %s946_s5 = scalar_lea.sflag [#allocation3], %s945_s24 }
 0x159   : > { %p1340_p1 = pnand %p1343_p0, %p1569_p8 }
 0x15b   : > { %p1341_p2 = pneg %p1340_p1 }
 0x15d   : > { %1468 = dma.done.wait (%p1341_p2), %s946_s5, 128  }
 0x15e   : > { %1470 = vsyncadd (%p1341_p2), %s946_s5, 4294967168  ;;  %s18_s20 = sadd.s32 1, %s1493_s20   ;;  %s1828_s15 = smov %s1477_s16 }
 0x15f   : > { %p15_p3 = scmp.ge.s32.totalorder %s18_s20, 4   ;;  %s1829_s16 = smov %s1481_s17 }
 0x160   : > { %s1830_s17 = smov %s1575_s28  ;;  %s1831_s18 = smov %s1489_s19 }
 0x161   : > { %s1832_s19 = smov %s1834_s23  ;;  %17 = sbr.rel (!%p15_p3) target bundleno = 4 (0x4), region = 85 }
 0x166   :  { %951 = vsyncpa [#allocation3], 1 }
 0x167   :  { %953 = vsyncpa [#allocation3 + $0x1], 1 }

// kernel: discriminator_forward.6
= control target key start
LH: loop header
LB: loop body
LE: loop exit
PB: predicated region body
PF: predicated region fallthrough
CT: control target
= control target key end

     0   :  { %v575_v16 = vmov 0.0   ;;  %s697_s1 = inlined_call_operand.vmem [shape: bf16[128,128], index: 1, kind: input, shape index: {}]   ;;  %s698_s0 = inlined_call_operand.vmem [shape: bf16[128,128], index: 0, kind: input, shape index: {}]   ;;  %s699_s4 = inlined_call_operand.vmem [shape: f32[8,128], index: 4, kind: output, shape index: {1}]   ;;  %s700_s2 = inlined_call_operand.vmem [shape: f32[1,128], index: 2, kind: input, shape index: {}]   ;;  %s701_s3 = inlined_call_operand.vmem [shape: bf16[128,128], index: 3, kind: output, shape index: {0}]  }
   0x1   :  { %v559_v0 = vld [vmem:[%s697_s1 + $0x38] sm:$0xff]   ;;  %v560_v1 = vld [vmem:[%s697_s1 + $0x30] sm:$0xff]   ;;  %v561_v2 = vld [vmem:[%s697_s1 + $0x28] sm:$0xff]   ;;  %249 = vst [vmem:[%s699_s4] sm:$0xff] %v575_v16 }
   0x2   :  { %510 = vmatprep.subr.bf16.mxu0 %v559_v0  ;;  %542 = vmatprep.subr.bf16.mxu1 %v559_v0  ;;  %v562_v3 = vld [vmem:[%s697_s1 + $0x20] sm:$0xff]   ;;  %v563_v5 = vld [vmem:[%s697_s1 + $0x18] sm:$0xff]   ;;  %v564_v7 = vld [vmem:[%s697_s1 + $0x10] sm:$0xff]  }
   0x3   :  { %511 = vmatpush3.bf16.msra.mxu0 %v559_v0  ;;  %550 = vmatpush3.bf16.msra.mxu1 %v559_v0  ;;  %v567_v4 = vld [vmem:[%s698_s0] sm:$0xff]   ;;  %v565_v8 = vld [vmem:[%s697_s1 + $0x8] sm:$0xff]   ;;  %v569_v12 = vld [vmem:[%s698_s0 + $0x10] sm:$0xff]  }
   0x4   :  { %512 = vmatprep.subr.bf16.mxu0 %v560_v1  ;;  %543 = vmatprep.subr.bf16.mxu1 %v560_v1  ;;  %v571_v6 = vld [vmem:[%s698_s0 + $0x20] sm:$0xff]   ;;  %v568_v10 = vld [vmem:[%s698_s0 + $0x8] sm:$0xff]   ;;  %v573_v13 = vld [vmem:[%s698_s0 + $0x30] sm:$0xff]  }
   0x5   :  { %526 = vmatprep.mubr.bf16.mxu0 %v567_v4  ;;  %534 = vmatprep.mubr.bf16.mxu1 %v571_v6  ;;  %v566_v9 = vld [vmem:[%s697_s1] sm:$0xff]   ;;  %v572_v11 = vld [vmem:[%s698_s0 + $0x28] sm:$0xff]   ;;  %v570_v14 = vld [vmem:[%s698_s0 + $0x18] sm:$0xff]  }
   0x6   :  { %v574_v15 = vld [vmem:[%s698_s0 + $0x38] sm:$0xff]   ;;  %v398_v19 = vld [vmem:[%s700_s2] ss:$0 sm:$0xff] }
   0x7   :  { %513 = vmatpush3.bf16.msra.mxu0 %v560_v1  ;;  %551 = vmatpush3.bf16.msra.mxu1 %v560_v1 }
   0x8   :  { %514 = vmatprep.subr.bf16.mxu0 %v561_v2  ;;  %544 = vmatprep.subr.bf16.mxu1 %v561_v2 }
   0xb   :  { %515 = vmatpush3.bf16.msra.mxu0 %v561_v2  ;;  %552 = vmatpush3.bf16.msra.mxu1 %v561_v2 }
   0xc   :  { %516 = vmatprep.subr.bf16.mxu0 %v562_v3  ;;  %545 = vmatprep.subr.bf16.mxu1 %v562_v3 }
   0xf   :  { %517 = vmatpush3.bf16.msra.mxu0 %v562_v3  ;;  %553 = vmatpush3.bf16.msra.mxu1 %v562_v3 }
  0x10   :  { %518 = vmatprep.subr.bf16.mxu0 %v563_v5  ;;  %546 = vmatprep.subr.bf16.mxu1 %v563_v5 }
  0x13   :  { %519 = vmatpush3.bf16.msra.mxu0 %v563_v5  ;;  %554 = vmatpush3.bf16.msra.mxu1 %v563_v5 }
  0x14   :  { %520 = vmatprep.subr.bf16.mxu0 %v564_v7  ;;  %547 = vmatprep.subr.bf16.mxu1 %v564_v7 }
  0x17   :  { %521 = vmatpush3.bf16.msra.mxu0 %v564_v7  ;;  %555 = vmatpush3.bf16.msra.mxu1 %v564_v7 }
  0x18   :  { %522 = vmatprep.subr.bf16.mxu0 %v565_v8  ;;  %548 = vmatprep.subr.bf16.mxu1 %v565_v8 }
  0x1b   :  { %523 = vmatpush3.bf16.msra.mxu0 %v565_v8  ;;  %556 = vmatpush3.bf16.msra.mxu1 %v565_v8 }
  0x1c   :  { %524 = vmatprep.subr.bf16.mxu0 %v566_v9  ;;  %549 = vmatprep.subr.bf16.mxu1 %v566_v9 }
  0x1f   :  { %525 = vmatpush3.bf16.msra.mxu0 %v566_v9  ;;  %557 = vmatpush3.bf16.msra.mxu1 %v566_v9 }
  0x22   :  { %527 = vmatmul.mubr.bf16.vlgmr.msra.gmra.mxu0 %v568_v10  ;;  %535 = vmatmul.mubr.bf16.vlgmr.msra.gmra.mxu1 %v572_v11 }
  0x23   :  { %530 = vmatprep.mubr.bf16.mxu0 %v569_v12  ;;  %538 = vmatprep.mubr.bf16.mxu1 %v573_v13 }
  0x2a   :  { %531 = vmatmul.mubr.bf16.gmra.mxu0 %v570_v14  ;;  %539 = vmatmul.mubr.bf16.gmra.mxu1 %v574_v15 }
  0xe2   :  { %v528_v17 = vpop.f32.mrf.mxu0  ;;  %v536_v18 = vpop.f32.mrf.mxu1 }
  0xe3   :  { %v655_v23 = vadd.f32 %v536_v18, %v398_v19  ;;  %v195_v25 = vadd.f32 %v528_v17, %v398_v19 }
  0xe4   :  { %v186_v20 = vpop.f32.mrf.mxu0  ;;  %v218_v21 = vpop.f32.mrf.mxu1 }
  0xe5   :  { %v187_v26 = vadd.f32 %v398_v19, %v186_v20  ;;  %v219_v30 = vadd.f32 %v398_v19, %v218_v21  ;;  %v274_v45 = vmul.f32 %v195_v25, %v195_v25  ;;  %v282_v21 = vmul.f32 %v655_v23, %v655_v23 }
  0xe6   :  { %v529_v22 = vpop.f32.mrf.mxu0  ;;  %v537_v24 = vpop.f32.mrf.mxu1 }
  0xe7   :  { %v198_v27 = vadd.f32 %v529_v22, %v398_v19  ;;  %v657_v28 = vadd.f32 %v537_v24, %v398_v19  ;;  %v272_v38 = vmul.f32 %v187_v26, %v187_v26  ;;  %v280_v15 = vmul.f32 %v219_v30, %v219_v30 }
  0xe8   :  { %v189_v29 = vpop.f32.mrf.mxu0  ;;  %v221_v31 = vpop.f32.mrf.mxu1 }
  0xe9   :  { %v455_v32 = vpack.c.bf16 %v198_v27, %v195_v25  ;;  %v190_v33 = vadd.f32 %v398_v19, %v189_v29  ;;  %v475_v35 = vpack.c.bf16 %v657_v28, %v655_v23  ;;  %v222_v36 = vadd.f32 %v398_v19, %v221_v31 }
  0xea   :  { %v532_v34 = vpop.f32.mrf.mxu0  ;;  %v540_v37 = vpop.f32.mrf.mxu1  ;;  %v275_v49 = vmul.f32 %v198_v27, %v198_v27 }
  0xeb   :  { %487 = vst [vmem:[%s701_s3 + $0x8] sm:$0xff] %v455_v32   ;;  %v250_v39 = vadd.f32 %v190_v33, %v187_v26  ;;  %v273_v40 = vmul.f32 %v190_v33, %v190_v33  ;;  %v450_v41 = vpack.c.bf16 %v190_v33, %v187_v26  ;;  %491 = vst [vmem:[%s701_s3 + $0x28] sm:$0xff] %v475_v35  }
  0xec   :  { %v202_v42 = vpop.f32.mrf.mxu0  ;;  %v470_v43 = vpack.c.bf16 %v222_v36, %v219_v30  ;;  %v234_v44 = vpop.f32.mrf.mxu1  ;;  %v243_v51 = vadd.f32 %v540_v37, %v398_v19  ;;  %v211_v54 = vadd.f32 %v532_v34, %v398_v19 }
  0xed   :  { %v251_v46 = vadd.f32 %v250_v39, %v195_v25  ;;  %v288_v47 = vadd.f32 %v273_v40, %v272_v38  ;;  %451 = vst [vmem:[%s701_s3] sm:$0xff] %v450_v41   ;;  %v203_v48 = vadd.f32 %v398_v19, %v202_v42  ;;  %v235_v58 = vadd.f32 %v398_v19, %v234_v44 }
  0xee   :  { %v533_v50 = vpop.f32.mrf.mxu0  ;;  %490 = vst [vmem:[%s701_s3 + $0x20] sm:$0xff] %v470_v43   ;;  %v541_v52 = vpop.f32.mrf.mxu1  ;;  %v278_v9 = vmul.f32 %v211_v54, %v211_v54  ;;  %v283_v25 = vmul.f32 %v657_v28, %v657_v28  ;;  %v286_v35 = vmul.f32 %v243_v51, %v243_v51 }
  0xef   :  { %v289_v53 = vadd.f32 %v288_v47, %v274_v45  ;;  %v252_v55 = vadd.f32 %v251_v46, %v198_v27  ;;  %v214_v56 = vadd.f32 %v533_v50, %v398_v19  ;;  %v246_v59 = vadd.f32 %v541_v52, %v398_v19 }
  0xf0   :  { %v205_v57 = vpop.f32.mrf.mxu0  ;;  %v237_v60 = vpop.f32.mrf.mxu1  ;;  %v276_v62 = vmul.f32 %v203_v48, %v203_v48  ;;  %v284_v31 = vmul.f32 %v235_v58, %v235_v58 }
  0xf1   :  { %v253_v61 = vadd.f32 %v252_v55, %v203_v48  ;;  %v290_v63 = vadd.f32 %v289_v53, %v275_v49  ;;  %v465_v0 = vpack.c.bf16 %v214_v56, %v211_v54  ;;  %v206_v1 = vadd.f32 %v398_v19, %v205_v57 }
  0xf2   :  { %v485_v2 = vpack.c.bf16 %v246_v59, %v243_v51  ;;  %v238_v3 = vadd.f32 %v398_v19, %v237_v60  ;;  %v279_v12 = vmul.f32 %v214_v56, %v214_v56  ;;  %v281_v19 = vmul.f32 %v222_v36, %v222_v36 }
  0xf3   :  { %v291_v4 = vadd.f32 %v290_v63, %v276_v62  ;;  %489 = vst [vmem:[%s701_s3 + $0x18] sm:$0xff] %v465_v0   ;;  %v254_v5 = vadd.f32 %v253_v61, %v206_v1  ;;  %v277_v6 = vmul.f32 %v206_v1, %v206_v1  ;;  %v460_v7 = vpack.c.bf16 %v206_v1, %v203_v48 }
  0xf4   :  { %493 = vst [vmem:[%s701_s3 + $0x38] sm:$0xff] %v485_v2   ;;  %v480_v8 = vpack.c.bf16 %v238_v3, %v235_v58  ;;  %v285_v34 = vmul.f32 %v238_v3, %v238_v3  ;;  %v287_v38 = vmul.f32 %v246_v59, %v246_v59 }
  0xf5   :  { %v255_v10 = vadd.f32 %v254_v5, %v211_v54  ;;  %v292_v11 = vadd.f32 %v291_v4, %v277_v6  ;;  %488 = vst [vmem:[%s701_s3 + $0x10] sm:$0xff] %v460_v7  }
  0xf6   :  { %492 = vst [vmem:[%s701_s3 + $0x30] sm:$0xff] %v480_v8  }
  0xf7   :  { %v293_v13 = vadd.f32 %v292_v11, %v278_v9  ;;  %v256_v14 = vadd.f32 %v255_v10, %v214_v56 }
  0xf9   :  { %v257_v16 = vadd.f32 %v256_v14, %v219_v30  ;;  %v294_v17 = vadd.f32 %v293_v13, %v279_v12 }
  0xfb   :  { %v258_v18 = vadd.f32 %v257_v16, %v222_v36  ;;  %v295_v20 = vadd.f32 %v294_v17, %v280_v15 }
  0xfd   :  { %v259_v22 = vadd.f32 %v258_v18, %v655_v23  ;;  %v296_v24 = vadd.f32 %v295_v20, %v281_v19 }
  0xff   :  { %v297_v26 = vadd.f32 %v296_v24, %v282_v21  ;;  %v260_v27 = vadd.f32 %v259_v22, %v657_v28 }
 0x101   :  { %v261_v29 = vadd.f32 %v260_v27, %v235_v58  ;;  %v298_v32 = vadd.f32 %v297_v26, %v283_v25 }
 0x103   :  { %v299_v30 = vadd.f32 %v298_v32, %v284_v31  ;;  %v262_v33 = vadd.f32 %v261_v29, %v238_v3 }
 0x105   :  { %v263_v36 = vadd.f32 %v262_v33, %v243_v51  ;;  %v300_v37 = vadd.f32 %v299_v30, %v285_v34 }
 0x107   :  { %v264_v39 = vadd.f32 %v263_v36, %v246_v59  ;;  %v301_v40 = vadd.f32 %v300_v37, %v286_v35 }
 0x109   :  { %v265_v23 = vrot.slane %v264_v39, 4  ;;  %v302_v41 = vadd.f32 %v301_v40, %v287_v38 }
 0x10b   :  { %v266_v42 = vadd.f32 %v265_v23, %v264_v39  ;;  %v303_v43 = vrot.slane %v302_v41, 4 }
 0x10d   :  { %v267_v44 = vrot.slane %v266_v42, 2  ;;  %v304_v45 = vadd.f32 %v303_v43, %v302_v41 }
 0x10f   :  { %v268_v46 = vadd.f32 %v267_v44, %v266_v42  ;;  %v305_v28 = vrot.slane %v304_v45, 2 }
 0x111   :  { %v269_v47 = vrot.slane %v268_v46, 1  ;;  %v306_v48 = vadd.f32 %v305_v28, %v304_v45 }
 0x113   :  { %v270_v49 = vadd.f32 %v269_v47, %v268_v46  ;;  %v307_v50 = vrot.slane %v306_v48, 1 }
 0x115   :  { %271 = vst [vmem:[%s699_s4] sm:$0x1] %v270_v49  ;;  %v308_v51 = vadd.f32 %v307_v50, %v306_v48 }
 0x117   :  { %309 = vst [vmem:[%s699_s4 + $0x1] sm:$0x1] %v308_v51 }

// kernel: discriminator_forward.7
= control target key start
LH: loop header
LB: loop body
LE: loop exit
PB: predicated region body
PF: predicated region fallthrough
CT: control target
= control target key end

     0   :  { %v385_v20 = vmov 0.0   ;;  %s489_s1 = inlined_call_operand.vmem [shape: bf16[256,128], index: 1, kind: input, shape index: {}]   ;;  %s490_s0 = inlined_call_operand.vmem [shape: bf16[32,256], index: 0, kind: input, shape index: {}]   ;;  %s491_s4 = inlined_call_operand.vmem [shape: f32[8,128], index: 4, kind: output, shape index: {1}]   ;;  %s492_s2 = inlined_call_operand.vmem [shape: f32[1,128], index: 2, kind: input, shape index: {}]   ;;  %s493_s3 = inlined_call_operand.vmem [shape: bf16[32,128], index: 3, kind: output, shape index: {0}]  }
   0x1   :  { %v363_v0 = vld [vmem:[%s489_s1 + $0x78] sm:$0xff]   ;;  %v365_v2 = vld [vmem:[%s489_s1 + $0x70] sm:$0xff]   ;;  %v367_v4 = vld [vmem:[%s489_s1 + $0x68] sm:$0xff]   ;;  %225 = vst [vmem:[%s491_s4] sm:$0xff] %v385_v20 }
   0x2   :  { %v364_v1 = vld [vmem:[%s489_s1 + $0x38] sm:$0xff]   ;;  %318 = vmatprep.subr.bf16.mxu0 %v363_v0  ;;  %346 = vmatprep.subr.bf16.mxu1 %v363_v0  ;;  %v366_v3 = vld [vmem:[%s489_s1 + $0x30] sm:$0xff]   ;;  %v368_v5 = vld [vmem:[%s489_s1 + $0x28] sm:$0xff]  }
   0x3   :  { %319 = vmatpush3.bf16.msra.mxu0 %v364_v1  ;;  %354 = vmatpush3.bf16.msra.mxu1 %v364_v1  ;;  %v369_v6 = vld [vmem:[%s489_s1 + $0x60] sm:$0xff]   ;;  %v371_v8 = vld [vmem:[%s489_s1 + $0x58] sm:$0xff]   ;;  %v373_v10 = vld [vmem:[%s489_s1 + $0x50] sm:$0xff]  }
   0x4   :  { %320 = vmatprep.subr.bf16.mxu0 %v365_v2  ;;  %347 = vmatprep.subr.bf16.mxu1 %v365_v2  ;;  %v370_v7 = vld [vmem:[%s489_s1 + $0x20] sm:$0xff]   ;;  %v372_v9 = vld [vmem:[%s489_s1 + $0x18] sm:$0xff]   ;;  %v374_v13 = vld [vmem:[%s489_s1 + $0x10] sm:$0xff]  }
   0x5   :  { %v381_v11 = vld [vmem:[%s490_s0 + $0x4] ss:$8 sps:$4 sm:$0xff]   ;;  %v384_v12 = vld [vmem:[%s490_s0 + $0x14] ss:$8 sps:$4 sm:$0xff]   ;;  %v379_v18 = vld [vmem:[%s490_s0] ss:$8 sps:$4 sm:$0xff]  }
   0x6   :  { %v375_v14 = vld [vmem:[%s489_s1 + $0x48] sm:$0xff]   ;;  %208 = vmatprep.mubr.bf16.mxu0 %v381_v11  ;;  %216 = vmatprep.mubr.bf16.mxu1 %v384_v12  ;;  %v377_v16 = vld [vmem:[%s489_s1 + $0x40] sm:$0xff]   ;;  %v382_v19 = vld [vmem:[%s490_s0 + $0x10] ss:$8 sps:$4 sm:$0xff]  }
   0x7   :  { %321 = vmatpush3.bf16.msra.mxu0 %v366_v3  ;;  %355 = vmatpush3.bf16.msra.mxu1 %v366_v3  ;;  %v376_v15 = vld [vmem:[%s489_s1 + $0x8] sm:$0xff]   ;;  %v378_v17 = vld [vmem:[%s489_s1] sm:$0xff]  }
   0x8   :  { %322 = vmatprep.subr.bf16.mxu0 %v367_v4  ;;  %348 = vmatprep.subr.bf16.mxu1 %v367_v4  ;;  %v278_v26 = vld [vmem:[%s492_s2] ss:$0 sm:$0xff] }
   0xb   :  { %323 = vmatpush3.bf16.msra.mxu0 %v368_v5  ;;  %356 = vmatpush3.bf16.msra.mxu1 %v368_v5 }
   0xc   :  { %324 = vmatprep.subr.bf16.mxu0 %v369_v6  ;;  %349 = vmatprep.subr.bf16.mxu1 %v369_v6 }
   0xf   :  { %325 = vmatpush3.bf16.msra.mxu0 %v370_v7  ;;  %357 = vmatpush3.bf16.msra.mxu1 %v370_v7 }
  0x10   :  { %326 = vmatprep.subr.bf16.mxu0 %v371_v8  ;;  %350 = vmatprep.subr.bf16.mxu1 %v371_v8 }
  0x13   :  { %327 = vmatpush3.bf16.msra.mxu0 %v372_v9  ;;  %358 = vmatpush3.bf16.msra.mxu1 %v372_v9 }
  0x14   :  { %328 = vmatprep.subr.bf16.mxu0 %v373_v10  ;;  %351 = vmatprep.subr.bf16.mxu1 %v373_v10 }
  0x17   :  { %329 = vmatpush3.bf16.msra.mxu0 %v374_v13  ;;  %359 = vmatpush3.bf16.msra.mxu1 %v374_v13 }
  0x18   :  { %330 = vmatprep.subr.bf16.mxu0 %v375_v14  ;;  %352 = vmatprep.subr.bf16.mxu1 %v375_v14 }
  0x1b   :  { %331 = vmatpush3.bf16.msra.mxu0 %v376_v15  ;;  %360 = vmatpush3.bf16.msra.mxu1 %v376_v15 }
  0x1c   :  { %332 = vmatprep.subr.bf16.mxu0 %v377_v16  ;;  %353 = vmatprep.subr.bf16.mxu1 %v377_v16 }
  0x1f   :  { %333 = vmatpush3.bf16.msra.mxu0 %v378_v17  ;;  %361 = vmatpush3.bf16.msra.mxu1 %v378_v17 }
  0x22   :  { %209 = vmatmul.mubr.bf16.vlgmr.msra.gmra.mxu0 %v379_v18  ;;  %217 = vmatmul.mubr.bf16.vlgmr.msra.gmra.mxu1 %v382_v19 }
  0xe2   :  { %v334_v21 = vpop.f32.mrf.mxu0  ;;  %v340_v22 = vpop.f32.mrf.mxu1 }
  0xe4   :  { %v335_v23 = vpop.f32.mrf.mxu0  ;;  %v341_v24 = vpop.f32.mrf.mxu1 }
  0xe5   :  { %v336_v25 = vadd.f32 %v335_v23, %v334_v21  ;;  %v342_v29 = vadd.f32 %v341_v24, %v340_v22 }
  0xe6   :  { %v337_v27 = vpop.f32.mrf.mxu0  ;;  %v343_v28 = vpop.f32.mrf.mxu1 }
  0xe7   :  { %v211_v32 = vadd.f32 %v336_v25, %v278_v26  ;;  %v219_v35 = vadd.f32 %v342_v29, %v278_v26 }
  0xe8   :  { %v338_v30 = vpop.f32.mrf.mxu0  ;;  %v344_v31 = vpop.f32.mrf.mxu1 }
  0xe9   :  { %v339_v33 = vadd.f32 %v338_v30, %v337_v27  ;;  %v345_v34 = vadd.f32 %v344_v31, %v343_v28  ;;  %v236_v38 = vmul.f32 %v211_v32, %v211_v32  ;;  %v238_v43 = vmul.f32 %v219_v35, %v219_v35 }
  0xeb   :  { %v214_v36 = vadd.f32 %v339_v33, %v278_v26  ;;  %v222_v37 = vadd.f32 %v345_v34, %v278_v26 }
  0xed   :  { %v226_v39 = vadd.f32 %v214_v36, %v211_v32  ;;  %v237_v40 = vmul.f32 %v214_v36, %v214_v36  ;;  %v310_v41 = vpack.c.bf16 %v214_v36, %v211_v32  ;;  %v315_v42 = vpack.c.bf16 %v222_v37, %v219_v35 }
  0xee   :  { %v239_v47 = vmul.f32 %v222_v37, %v222_v37 }
  0xef   :  { %v240_v44 = vadd.f32 %v237_v40, %v236_v38  ;;  %311 = vst [vmem:[%s493_s3] sm:$0xff] %v310_v41   ;;  %v227_v45 = vadd.f32 %v226_v39, %v219_v35  ;;  %317 = vst [vmem:[%s493_s3 + $0x8] sm:$0xff] %v315_v42  }
  0xf1   :  { %v228_v46 = vadd.f32 %v227_v45, %v222_v37  ;;  %v241_v48 = vadd.f32 %v240_v44, %v238_v43 }
  0xf3   :  { %v229_v49 = vrot.slane %v228_v46, 4  ;;  %v242_v50 = vadd.f32 %v241_v48, %v239_v47 }
  0xf5   :  { %v230_v51 = vadd.f32 %v229_v49, %v228_v46  ;;  %v243_v52 = vrot.slane %v242_v50, 4 }
  0xf7   :  { %v231_v53 = vrot.slane %v230_v51, 2  ;;  %v244_v54 = vadd.f32 %v243_v52, %v242_v50 }
  0xf9   :  { %v232_v55 = vadd.f32 %v231_v53, %v230_v51  ;;  %v245_v56 = vrot.slane %v244_v54, 2 }
  0xfb   :  { %v233_v57 = vrot.slane %v232_v55, 1  ;;  %v246_v58 = vadd.f32 %v245_v56, %v244_v54 }
  0xfd   :  { %v234_v59 = vadd.f32 %v233_v57, %v232_v55  ;;  %v247_v60 = vrot.slane %v246_v58, 1 }
  0xff   :  { %235 = vst [vmem:[%s491_s4] sm:$0x1] %v234_v59  ;;  %v248_v61 = vadd.f32 %v247_v60, %v246_v58 }
 0x101   :  { %249 = vst [vmem:[%s491_s4 + $0x1] sm:$0x1] %v248_v61 }

// kernel: discriminator_forward.8
= control target key start
LH: loop header
LB: loop body
LE: loop exit
PB: predicated region body
PF: predicated region fallthrough
CT: control target
= control target key end

     0   :  { %v628_v42 = vmov 0.0   ;;  %v416_v46 = vlaneseq  ;;  %s786_s1 = inlined_call_operand.vmem [shape: bf16[512,128], index: 1, kind: input, shape index: {}]   ;;  %s787_s0 = inlined_call_operand.vmem [shape: bf16[24,512], index: 0, kind: input, shape index: {}]   ;;  %s788_s4 = inlined_call_operand.vmem [shape: f32[8,128], index: 4, kind: output, shape index: {1}]   ;;  %s789_s2 = inlined_call_operand.vmem [shape: f32[1,128], index: 2, kind: input, shape index: {}]   ;;  %s790_s3 = inlined_call_operand.vmem [shape: bf16[24,128], index: 3, kind: output, shape index: {0}]  }
   0x1   :  { %v586_v0 = vld [vmem:[%s786_s1 + $0x78] sm:$0xff]   ;;  %v590_v4 = vld [vmem:[%s786_s1 + $0x70] sm:$0xff]   ;;  %v594_v8 = vld [vmem:[%s786_s1 + $0x68] sm:$0xff]   ;;  %431 = vst [vmem:[%s788_s4] sm:$0xff] %v628_v42 }
   0x2   :  { %v587_v1 = vld [vmem:[%s786_s1 + $0xf8] sm:$0xff]   ;;  %529 = vmatprep.subr.bf16.mxu0 %v586_v0  ;;  %v591_v5 = vld [vmem:[%s786_s1 + $0xf0] sm:$0xff]   ;;  %v595_v9 = vld [vmem:[%s786_s1 + $0xe8] sm:$0xff]   ;;  %v417_v53 = vshrl.u32 %v416_v46, 7 }
   0x3   :  { %v588_v2 = vld [vmem:[%s786_s1 + $0x38] sm:$0xff]   ;;  %557 = vmatprep.subr.bf16.mxu1 %v587_v1  ;;  %v592_v6 = vld [vmem:[%s786_s1 + $0x30] sm:$0xff]   ;;  %v596_v10 = vld [vmem:[%s786_s1 + $0x28] sm:$0xff]  }
   0x4   :  { %v589_v3 = vld [vmem:[%s786_s1 + $0xb8] sm:$0xff]   ;;  %530 = vmatpush3.bf16.msra.mxu0 %v588_v2  ;;  %v593_v7 = vld [vmem:[%s786_s1 + $0xb0] sm:$0xff]   ;;  %v597_v11 = vld [vmem:[%s786_s1 + $0xa8] sm:$0xff]   ;;  %v419_v63 = vadd.s32 16, %v417_v53 }
   0x5   :  { %558 = vmatpush3.bf16.msra.mxu1 %v589_v3  ;;  %531 = vmatprep.subr.bf16.mxu0 %v590_v4  ;;  %v598_v12 = vld [vmem:[%s786_s1 + $0x60] sm:$0xff]   ;;  %v602_v16 = vld [vmem:[%s786_s1 + $0x58] sm:$0xff]   ;;  %v606_v20 = vld [vmem:[%s786_s1 + $0x50] sm:$0xff]  }
   0x6   :  { %559 = vmatprep.subr.bf16.mxu1 %v591_v5  ;;  %v599_v13 = vld [vmem:[%s786_s1 + $0xe0] sm:$0xff]   ;;  %v603_v17 = vld [vmem:[%s786_s1 + $0xd8] sm:$0xff]   ;;  %v607_v21 = vld [vmem:[%s786_s1 + $0xd0] sm:$0xff]   ;;  %vm427_vm0 = vcmp.lt.s32.totalorder %v419_v63, 18 }
   0x7   :  { %v600_v14 = vld [vmem:[%s786_s1 + $0x20] sm:$0xff]   ;;  %v604_v18 = vld [vmem:[%s786_s1 + $0x18] sm:$0xff]   ;;  %v608_v22 = vld [vmem:[%s786_s1 + $0x10] sm:$0xff]  }
   0x8   :  { %532 = vmatpush3.bf16.msra.mxu0 %v592_v6  ;;  %v601_v15 = vld [vmem:[%s786_s1 + $0xa0] sm:$0xff]   ;;  %v605_v19 = vld [vmem:[%s786_s1 + $0x98] sm:$0xff]   ;;  %v609_v23 = vld [vmem:[%s786_s1 + $0x90] sm:$0xff]  }
   0x9   :  { %560 = vmatpush3.bf16.msra.mxu1 %v593_v7  ;;  %533 = vmatprep.subr.bf16.mxu0 %v594_v8  ;;  %v610_v24 = vld [vmem:[%s786_s1 + $0x48] sm:$0xff]   ;;  %v614_v28 = vld [vmem:[%s786_s1 + $0x40] sm:$0xff]  }
   0xa   :  { %561 = vmatprep.subr.bf16.mxu1 %v595_v9  ;;  %v611_v25 = vld [vmem:[%s786_s1 + $0xc8] sm:$0xff]   ;;  %v615_v29 = vld [vmem:[%s786_s1 + $0xc0] sm:$0xff]  }
   0xb   :  { %v612_v26 = vld [vmem:[%s786_s1 + $0x8] sm:$0xff]   ;;  %v616_v30 = vld [vmem:[%s786_s1] sm:$0xff]  }
   0xc   :  { %534 = vmatpush3.bf16.msra.mxu0 %v596_v10  ;;  %v613_v27 = vld [vmem:[%s786_s1 + $0x88] sm:$0xff]   ;;  %v617_v31 = vld [vmem:[%s786_s1 + $0x80] sm:$0xff]  }
   0xd   :  { %562 = vmatpush3.bf16.msra.mxu1 %v597_v11  ;;  %535 = vmatprep.subr.bf16.mxu0 %v598_v12  ;;  %v618_v32 = vld [vmem:[%s787_s0] ss:$16 sps:$4 sm:$0xff]   ;;  %v620_v33 = vld [vmem:[%s787_s0 + $0x4] ss:$16 sps:$4 sm:$0xff]   ;;  %v621_v34 = vld [vmem:[%s787_s0 + $0x8] ss:$16 sps:$4 sm:$0xff]  }
   0xe   :  { %563 = vmatprep.subr.bf16.mxu1 %v599_v13  ;;  %v623_v35 = vld [vmem:[%s787_s0 + $0xc] ss:$16 sps:$4 sm:$0xff]   ;;  %v21_v36 = vld [vmem:[%s787_s0 + $0x20] sm:$0xff]  ;;  %352 = vmatprep.mubr.bf16.mxu0 %v620_v33 }
   0xf   :  { %v483_v37 = vcombine.high %v21_v36, %v21_v36  ;;  %v22_v38 = vld [vmem:[%s787_s0 + $0x28] sm:$0xff]  ;;  %400 = vmatprep.mubr.bf16.mxu1 %v623_v35  ;;  %v482_v40 = vcombine.low %v21_v36, %v21_v36  ;;  %v477_v49 = vld [vmem:[%s789_s2] ss:$0 sm:$0xff] }
  0x10   :  { %536 = vmatpush3.bf16.msra.mxu0 %v600_v14  ;;  %v485_v39 = vcombine.high %v22_v38, %v22_v38  ;;  %v484_v41 = vcombine.low %v22_v38, %v22_v38 }
  0x11   :  { %564 = vmatpush3.bf16.msra.mxu1 %v601_v15  ;;  %537 = vmatprep.subr.bf16.mxu0 %v602_v16 }
  0x12   :  { %565 = vmatprep.subr.bf16.mxu1 %v603_v17 }
  0x14   :  { %538 = vmatpush3.bf16.msra.mxu0 %v604_v18 }
  0x15   :  { %566 = vmatpush3.bf16.msra.mxu1 %v605_v19  ;;  %539 = vmatprep.subr.bf16.mxu0 %v606_v20 }
  0x16   :  { %567 = vmatprep.subr.bf16.mxu1 %v607_v21 }
  0x18   :  { %540 = vmatpush3.bf16.msra.mxu0 %v608_v22 }
  0x19   :  { %568 = vmatpush3.bf16.msra.mxu1 %v609_v23  ;;  %541 = vmatprep.subr.bf16.mxu0 %v610_v24 }
  0x1a   :  { %569 = vmatprep.subr.bf16.mxu1 %v611_v25 }
  0x1c   :  { %542 = vmatpush3.bf16.msra.mxu0 %v612_v26 }
  0x1d   :  { %570 = vmatpush3.bf16.msra.mxu1 %v613_v27  ;;  %543 = vmatprep.subr.bf16.mxu0 %v614_v28 }
  0x1e   :  { %571 = vmatprep.subr.bf16.mxu1 %v615_v29 }
  0x20   :  { %544 = vmatpush3.bf16.msra.mxu0 %v616_v30 }
  0x21   :  { %572 = vmatpush3.bf16.msra.mxu1 %v617_v31 }
  0x23   :  { %353 = vmatmul.mubr.bf16.vlgmr.msra.gmra.mxu0 %v618_v32 }
  0x24   :  { %401 = vmatmul.mubr.bf16.vlgmr.msra.gmra.mxu1 %v621_v34  ;;  %360 = vmatprep.mubr.bf16.mxu0 %v483_v37 }
  0x25   :  { %408 = vmatprep.mubr.bf16.mxu1 %v485_v39 }
  0x2b   :  { %361 = vmatmul.mubr.bf16.gmra.mxu0 %v482_v40 }
  0x2c   :  { %409 = vmatmul.mubr.bf16.gmra.mxu1 %v484_v41 }
  0xe3   :  { %v545_v43 = vpop.f32.mrf.mxu0 }
  0xe4   :  { %v573_v44 = vpop.f32.mrf.mxu1 }
  0xe5   :  { %v546_v45 = vpop.f32.mrf.mxu0 }
  0xe6   :  { %v547_v47 = vadd.f32 %v546_v45, %v545_v43  ;;  %v574_v48 = vpop.f32.mrf.mxu1 }
  0xe7   :  { %v548_v50 = vpop.f32.mrf.mxu0  ;;  %v575_v58 = vadd.f32 %v574_v48, %v573_v44 }
  0xe8   :  { %v576_v51 = vpop.f32.mrf.mxu1  ;;  %v355_v54 = vadd.f32 %v547_v47, %v477_v49 }
  0xe9   :  { %v549_v52 = vpop.f32.mrf.mxu0 }
  0xea   :  { %v550_v55 = vadd.f32 %v549_v52, %v548_v50  ;;  %v577_v56 = vpop.f32.mrf.mxu1  ;;  %v403_v0 = vadd.f32 %v575_v58, %v355_v54 }
  0xeb   :  { %v551_v57 = vpop.f32.mrf.mxu0  ;;  %v578_v60 = vadd.f32 %v577_v56, %v576_v51 }
  0xec   :  { %v358_v59 = vadd.f32 %v550_v55, %v477_v49  ;;  %v579_v61 = vpop.f32.mrf.mxu1  ;;  %v441_v13 = vmul.f32 %v403_v0, %v403_v0 }
  0xed   :  { %v552_v62 = vpop.f32.mrf.mxu0 }
  0xee   :  { %v406_v1 = vadd.f32 %v578_v60, %v358_v59  ;;  %v553_v2 = vadd.f32 %v552_v62, %v551_v57  ;;  %v580_v3 = vpop.f32.mrf.mxu1 }
  0xef   :  { %v554_v4 = vpop.f32.mrf.mxu0  ;;  %v581_v7 = vadd.f32 %v580_v3, %v579_v61 }
  0xf0   :  { %v527_v5 = vpack.c.bf16 %v406_v1, %v403_v0  ;;  %v363_v6 = vadd.f32 %v553_v2, %v477_v49  ;;  %v582_v8 = vpop.f32.mrf.mxu1  ;;  %v442_v9 = vmul.f32 %v406_v1, %v406_v1  ;;  %v432_v14 = vadd.f32 %v406_v1, %v403_v0 }
  0xf1   :  { %v555_v10 = vpop.f32.mrf.mxu0 }
  0xf2   :  { %v411_v11 = vadd.f32 %v581_v7, %v363_v6  ;;  %528 = vst [vmem:[%s790_s3] sm:$0xff] %v527_v5   ;;  %v583_v12 = vpop.f32.mrf.mxu1  ;;  %v444_v17 = vadd.f32 %v442_v9, %v441_v13 }
  0xf4   :  { %v430_v15 = vsel %vm427_vm0, %v411_v11, 0.0  ;;  %v523_v16 = vpack.c.bf16 %v411_v11, %v411_v11 }
  0xf5   :  { %v433_v18 = vadd.f32 %v432_v14, %v430_v15  ;;  %v443_v19 = vmul.f32 %v430_v15, %v430_v15 }
  0xf6   :  { %468 = vst [vmem:[%s790_s3 + $0x8] sm:$0xf] %v523_v16 }
  0xf7   :  { %v434_v20 = vrot.slane %v433_v18, 4  ;;  %v445_v21 = vadd.f32 %v444_v17, %v443_v19 }
  0xf9   :  { %v435_v22 = vadd.f32 %v434_v20, %v433_v18  ;;  %v446_v23 = vrot.slane %v445_v21, 4 }
  0xfb   :  { %v436_v24 = vrot.slane %v435_v22, 2  ;;  %v447_v25 = vadd.f32 %v446_v23, %v445_v21 }
  0xfd   :  { %v437_v26 = vadd.f32 %v436_v24, %v435_v22  ;;  %v448_v27 = vrot.slane %v447_v25, 2 }
  0xff   :  { %v438_v28 = vrot.slane %v437_v26, 1  ;;  %v449_v29 = vadd.f32 %v448_v27, %v447_v25 }
 0x101   :  { %v439_v30 = vadd.f32 %v438_v28, %v437_v26  ;;  %v450_v31 = vrot.slane %v449_v29, 1 }
 0x103   :  { %440 = vst [vmem:[%s788_s4] sm:$0x1] %v439_v30  ;;  %v451_v32 = vadd.f32 %v450_v31, %v449_v29 }
 0x105   :  { %452 = vst [vmem:[%s788_s4 + $0x1] sm:$0x1] %v451_v32 }

// kernel: discriminator_forward.9
= control target key start
LH: loop header
LB: loop body
LE: loop exit
PB: predicated region body
PF: predicated region fallthrough
CT: control target
= control target key end

     0   :  { %s1270_s0 = inlined_call_operand.vmem [shape: bf16[8,1024], index: 0, kind: input, shape index: {}]   ;;  %s1271_s1 = inlined_call_operand.vmem [shape: bf16[1024,128], index: 1, kind: input, shape index: {}]   ;;  %s1272_s2 = inlined_call_operand.vmem [shape: f32[1,128], index: 2, kind: input, shape index: {}]   ;;  %s1273_s3 = inlined_call_operand.vmem [shape: f32[8,128], index: 3, kind: output, shape index: {0}]   ;;  %s1274_s4 = inlined_call_operand.hbm [shape: f32[8,128], index: 4, kind: output, shape index: {1}]  }
   0x1   :  { %v932_v0 = vld [vmem:[%s1271_s1 + $0x78] sm:$0xff]   ;;  %v936_v4 = vld [vmem:[%s1271_s1 + $0x70] sm:$0xff]   ;;  %v940_v8 = vld [vmem:[%s1271_s1 + $0x68] sm:$0xff]  }
   0x2   :  { %v933_v1 = vld [vmem:[%s1271_s1 + $0xf8] sm:$0xff]   ;;  %842 = vmatprep.subr.bf16.mxu0 %v932_v0  ;;  %v937_v5 = vld [vmem:[%s1271_s1 + $0xf0] sm:$0xff]   ;;  %v941_v9 = vld [vmem:[%s1271_s1 + $0xe8] sm:$0xff]  }
   0x3   :  { %v934_v2 = vld [vmem:[%s1271_s1 + $0x38] sm:$0xff]   ;;  %864 = vmatprep.subr.bf16.mxu1 %v933_v1  ;;  %v938_v6 = vld [vmem:[%s1271_s1 + $0x30] sm:$0xff]   ;;  %v942_v10 = vld [vmem:[%s1271_s1 + $0x28] sm:$0xff]  }
   0x4   :  { %v935_v3 = vld [vmem:[%s1271_s1 + $0xb8] sm:$0xff]   ;;  %843 = vmatpush3.bf16.msra.mxu0 %v934_v2  ;;  %v939_v7 = vld [vmem:[%s1271_s1 + $0xb0] sm:$0xff]   ;;  %v943_v11 = vld [vmem:[%s1271_s1 + $0xa8] sm:$0xff]  }
   0x5   :  { %865 = vmatpush3.bf16.msra.mxu1 %v935_v3  ;;  %844 = vmatprep.subr.bf16.mxu0 %v936_v4  ;;  %v944_v12 = vld [vmem:[%s1271_s1 + $0x60] sm:$0xff]   ;;  %v948_v16 = vld [vmem:[%s1271_s1 + $0x58] sm:$0xff]   ;;  %v952_v20 = vld [vmem:[%s1271_s1 + $0x50] sm:$0xff]  }
   0x6   :  { %866 = vmatprep.subr.bf16.mxu1 %v937_v5  ;;  %v945_v13 = vld [vmem:[%s1271_s1 + $0xe0] sm:$0xff]   ;;  %v949_v17 = vld [vmem:[%s1271_s1 + $0xd8] sm:$0xff]   ;;  %v953_v21 = vld [vmem:[%s1271_s1 + $0xd0] sm:$0xff]  }
   0x7   :  { %v946_v14 = vld [vmem:[%s1271_s1 + $0x20] sm:$0xff]   ;;  %v950_v18 = vld [vmem:[%s1271_s1 + $0x18] sm:$0xff]   ;;  %v954_v22 = vld [vmem:[%s1271_s1 + $0x10] sm:$0xff]  }
   0x8   :  { %845 = vmatpush3.bf16.msra.mxu0 %v938_v6  ;;  %v947_v15 = vld [vmem:[%s1271_s1 + $0xa0] sm:$0xff]   ;;  %v951_v19 = vld [vmem:[%s1271_s1 + $0x98] sm:$0xff]   ;;  %v955_v23 = vld [vmem:[%s1271_s1 + $0x90] sm:$0xff]  }
   0x9   :  { %867 = vmatpush3.bf16.msra.mxu1 %v939_v7  ;;  %846 = vmatprep.subr.bf16.mxu0 %v940_v8  ;;  %v956_v24 = vld [vmem:[%s1271_s1 + $0x48] sm:$0xff]   ;;  %v960_v28 = vld [vmem:[%s1271_s1 + $0x40] sm:$0xff]   ;;  %v968_v38 = vld [vmem:[%s1271_s1 + $0x178] sm:$0xff]  }
   0xa   :  { %868 = vmatprep.subr.bf16.mxu1 %v941_v9  ;;  %v957_v25 = vld [vmem:[%s1271_s1 + $0xc8] sm:$0xff]   ;;  %v961_v29 = vld [vmem:[%s1271_s1 + $0xc0] sm:$0xff]   ;;  %v969_v39 = vld [vmem:[%s1271_s1 + $0x1f8] sm:$0xff]  }
   0xb   :  { %v958_v26 = vld [vmem:[%s1271_s1 + $0x8] sm:$0xff]   ;;  %v962_v30 = vld [vmem:[%s1271_s1] sm:$0xff]   ;;  %v970_v40 = vld [vmem:[%s1271_s1 + $0x138] sm:$0xff]  }
   0xc   :  { %847 = vmatpush3.bf16.msra.mxu0 %v942_v10  ;;  %v959_v27 = vld [vmem:[%s1271_s1 + $0x88] sm:$0xff]   ;;  %v963_v31 = vld [vmem:[%s1271_s1 + $0x80] sm:$0xff]   ;;  %v971_v41 = vld [vmem:[%s1271_s1 + $0x1b8] sm:$0xff]  }
   0xd   :  { %869 = vmatpush3.bf16.msra.mxu1 %v943_v11  ;;  %848 = vmatprep.subr.bf16.mxu0 %v944_v12  ;;  %v18_v32 = vld [vmem:[%s1270_s0] sm:$0xff]  ;;  %v19_v33 = vld [vmem:[%s1270_s0 + $0x8] sm:$0xff]  ;;  %v972_v42 = vld [vmem:[%s1271_s1 + $0x170] sm:$0xff]  }
   0xe   :  { %870 = vmatprep.subr.bf16.mxu1 %v945_v13  ;;  %v770_v34 = vcombine.low %v18_v32, %v18_v32  ;;  %v771_v35 = vcombine.high %v18_v32, %v18_v32  ;;  %v772_v36 = vcombine.low %v19_v33, %v19_v33  ;;  %v773_v37 = vcombine.high %v19_v33, %v19_v33  ;;  %v973_v43 = vld [vmem:[%s1271_s1 + $0x1f0] sm:$0xff]   ;;  %v976_v46 = vld [vmem:[%s1271_s1 + $0x168] sm:$0xff]   ;;  %v980_v50 = vld [vmem:[%s1271_s1 + $0x160] sm:$0xff]  }
   0xf   :  { %v974_v44 = vld [vmem:[%s1271_s1 + $0x130] sm:$0xff]   ;;  %v977_v47 = vld [vmem:[%s1271_s1 + $0x1e8] sm:$0xff]   ;;  %v981_v51 = vld [vmem:[%s1271_s1 + $0x1e0] sm:$0xff]  }
  0x10   :  { %849 = vmatpush3.bf16.msra.mxu0 %v946_v14  ;;  %601 = vmatprep.mubr.bf16.mxu0 %v771_v35  ;;  %v975_v45 = vld [vmem:[%s1271_s1 + $0x1b0] sm:$0xff]   ;;  %v978_v48 = vld [vmem:[%s1271_s1 + $0x128] sm:$0xff]   ;;  %v982_v52 = vld [vmem:[%s1271_s1 + $0x120] sm:$0xff]  }
  0x11   :  { %871 = vmatpush3.bf16.msra.mxu1 %v947_v15  ;;  %850 = vmatprep.subr.bf16.mxu0 %v948_v16  ;;  %v979_v49 = vld [vmem:[%s1271_s1 + $0x1a8] sm:$0xff]   ;;  %v983_v53 = vld [vmem:[%s1271_s1 + $0x1a0] sm:$0xff]   ;;  %v984_v54 = vld [vmem:[%s1271_s1 + $0x158] sm:$0xff]  }
  0x12   :  { %872 = vmatprep.subr.bf16.mxu1 %v949_v17  ;;  %641 = vmatprep.mubr.bf16.mxu1 %v773_v37  ;;  %v985_v55 = vld [vmem:[%s1271_s1 + $0x1d8] sm:$0xff]   ;;  %v988_v58 = vld [vmem:[%s1271_s1 + $0x150] sm:$0xff]   ;;  %v992_v62 = vld [vmem:[%s1271_s1 + $0x148] sm:$0xff]  }
  0x13   :  { %v986_v56 = vld [vmem:[%s1271_s1 + $0x118] sm:$0xff]   ;;  %v989_v59 = vld [vmem:[%s1271_s1 + $0x1d0] sm:$0xff]   ;;  %v993_v63 = vld [vmem:[%s1271_s1 + $0x1c8] sm:$0xff]  }
  0x14   :  { %851 = vmatpush3.bf16.msra.mxu0 %v950_v18  ;;  %v987_v57 = vld [vmem:[%s1271_s1 + $0x198] sm:$0xff]   ;;  %v990_v60 = vld [vmem:[%s1271_s1 + $0x110] sm:$0xff]   ;;  %v994_v0 = vld [vmem:[%s1271_s1 + $0x108] sm:$0xff]  }
  0x15   :  { %873 = vmatpush3.bf16.msra.mxu1 %v951_v19  ;;  %852 = vmatprep.subr.bf16.mxu0 %v952_v20  ;;  %v991_v61 = vld [vmem:[%s1271_s1 + $0x190] sm:$0xff]   ;;  %v995_v1 = vld [vmem:[%s1271_s1 + $0x188] sm:$0xff]   ;;  %v996_v2 = vld [vmem:[%s1271_s1 + $0x140] sm:$0xff]  }
  0x16   :  { %874 = vmatprep.subr.bf16.mxu1 %v953_v21  ;;  %v997_v3 = vld [vmem:[%s1271_s1 + $0x1c0] sm:$0xff]   ;;  %v20_v6 = vld [vmem:[%s1270_s0 + $0x10] sm:$0xff]  ;;  %v21_v9 = vld [vmem:[%s1270_s0 + $0x18] sm:$0xff] }
  0x17   :  { %v998_v4 = vld [vmem:[%s1271_s1 + $0x100] sm:$0xff]   ;;  %v774_v7 = vcombine.low %v20_v6, %v20_v6  ;;  %v775_v8 = vcombine.high %v20_v6, %v20_v6 }
  0x18   :  { %853 = vmatpush3.bf16.msra.mxu0 %v954_v22  ;;  %v999_v5 = vld [vmem:[%s1271_s1 + $0x180] sm:$0xff]  }
  0x19   :  { %875 = vmatpush3.bf16.msra.mxu1 %v955_v23  ;;  %854 = vmatprep.subr.bf16.mxu0 %v956_v24 }
  0x1a   :  { %876 = vmatprep.subr.bf16.mxu1 %v957_v25 }
  0x1c   :  { %855 = vmatpush3.bf16.msra.mxu0 %v958_v26 }
  0x1d   :  { %877 = vmatpush3.bf16.msra.mxu1 %v959_v27  ;;  %856 = vmatprep.subr.bf16.mxu0 %v960_v28 }
  0x1e   :  { %878 = vmatprep.subr.bf16.mxu1 %v961_v29 }
  0x20   :  { %857 = vmatpush3.bf16.msra.mxu0 %v962_v30 }
  0x21   :  { %879 = vmatpush3.bf16.msra.mxu1 %v963_v31  ;;  %886 = vmatprep.subr.bf16.mxu0 %v968_v38 }
  0x22   :  { %908 = vmatprep.subr.bf16.mxu1 %v969_v39 }
  0x23   :  { %602 = vmatmul.mubr.bf16.vlgmr.msra.gmra.mxu0 %v770_v34 }
  0x24   :  { %642 = vmatmul.mubr.bf16.vlgmr.msra.gmra.mxu1 %v772_v36  ;;  %887 = vmatpush3.bf16.msra.mxu0 %v970_v40 }
  0x25   :  { %909 = vmatpush3.bf16.msra.mxu1 %v971_v41  ;;  %888 = vmatprep.subr.bf16.mxu0 %v972_v42 }
  0x26   :  { %910 = vmatprep.subr.bf16.mxu1 %v973_v43 }
  0x28   :  { %889 = vmatpush3.bf16.msra.mxu0 %v974_v44 }
  0x29   :  { %911 = vmatpush3.bf16.msra.mxu1 %v975_v45  ;;  %890 = vmatprep.subr.bf16.mxu0 %v976_v46 }
  0x2a   :  { %912 = vmatprep.subr.bf16.mxu1 %v977_v47 }
  0x2c   :  { %891 = vmatpush3.bf16.msra.mxu0 %v978_v48 }
  0x2d   :  { %913 = vmatpush3.bf16.msra.mxu1 %v979_v49  ;;  %892 = vmatprep.subr.bf16.mxu0 %v980_v50 }
  0x2e   :  { %914 = vmatprep.subr.bf16.mxu1 %v981_v51 }
  0x30   :  { %893 = vmatpush3.bf16.msra.mxu0 %v982_v52 }
  0x31   :  { %915 = vmatpush3.bf16.msra.mxu1 %v983_v53  ;;  %894 = vmatprep.subr.bf16.mxu0 %v984_v54 }
  0x32   :  { %916 = vmatprep.subr.bf16.mxu1 %v985_v55 }
  0x34   :  { %895 = vmatpush3.bf16.msra.mxu0 %v986_v56 }
  0x35   :  { %917 = vmatpush3.bf16.msra.mxu1 %v987_v57  ;;  %896 = vmatprep.subr.bf16.mxu0 %v988_v58 }
  0x36   :  { %918 = vmatprep.subr.bf16.mxu1 %v989_v59 }
  0x38   :  { %897 = vmatpush3.bf16.msra.mxu0 %v990_v60 }
  0x39   :  { %919 = vmatpush3.bf16.msra.mxu1 %v991_v61  ;;  %898 = vmatprep.subr.bf16.mxu0 %v992_v62 }
  0x3a   :  { %920 = vmatprep.subr.bf16.mxu1 %v993_v63 }
  0x3c   :  { %899 = vmatpush3.bf16.msra.mxu0 %v994_v0 }
  0x3d   :  { %921 = vmatpush3.bf16.msra.mxu1 %v995_v1  ;;  %900 = vmatprep.subr.bf16.mxu0 %v996_v2 }
  0x3e   :  { %922 = vmatprep.subr.bf16.mxu1 %v997_v3 }
  0x3f   :  { %10 = vsyncpa [#allocation3], 0  ;;  %v776_v10 = vcombine.low %v21_v9, %v21_v9  ;;  %v777_v11 = vcombine.high %v21_v9, %v21_v9  ;;  %681 = vmatprep.mubr.bf16.mxu0 %v775_v8  ;;  %v1030_v12 = vmov 0.0   ;;  %v769_v22 = vld [vmem:[%s1272_s2] ss:$0 sm:$0xff]  ;;  %s1031_s2 = smov [#allocation2]  }
  0x40   :  { %901 = vmatpush3.bf16.msra.mxu0 %v998_v4  ;;  %729 = vst [vmem:[#allocation2] sm:$0xff] %v1030_v12  ;;  %s759_s21 = sshll.u32 %s1031_s2, 4  ;;  %s760_s21 = int_to_ptr.vmem [resolvable:$true] %s759_s21 }
  0x41   :  { %923 = vmatpush3.bf16.msra.mxu1 %v999_v5  ;;  %721 = vmatprep.mubr.bf16.mxu1 %v777_v11  ;;  %s1008_s22 = scalar_lea.vmem %s760_s21, 128  ;;  %p1013_p1 = scmp.lt.s32.totalorder %s760_s21, %s760_s21 }
  0x42   :  { %p1009_p0 = scmp.ne.s32.totalorder %s760_s21, %s1008_s22  ;;  %p1014_p2 = scmp.lt.s32.totalorder %s1008_s22, %s1008_s22 }
  0x43   :  { %682 = vmatmul.mubr.bf16.vlgmr.msra.gmra.mxu0 %v774_v7 }
  0x44   :  { %722 = vmatmul.mubr.bf16.vlgmr.msra.gmra.mxu1 %v776_v10  ;;  %p1015_p3 = por %p1014_p2, %p1013_p1 }
  0x46   :  { %p1016_p4 = pnand %p1015_p3, %p1009_p0 }
  0xe3   :  { %v858_v13 = vpop.f32.mrf.mxu0 }
  0xe4   :  { %v880_v14 = vpop.f32.mrf.mxu1 }
  0xe5   :  { %v859_v15 = vpop.f32.mrf.mxu0 }
  0xe6   :  { %v881_v16 = vpop.f32.mrf.mxu1  ;;  %v860_v21 = vadd.f32 %v859_v15, %v858_v13 }
  0xe7   :  { %v861_v17 = vpop.f32.mrf.mxu0  ;;  %v882_v24 = vadd.f32 %v881_v16, %v880_v14 }
  0xe8   :  { %v883_v18 = vpop.f32.mrf.mxu1  ;;  %v604_v23 = vadd.f32 %v860_v21, %v769_v22 }
  0xe9   :  { %v862_v19 = vpop.f32.mrf.mxu0 }
  0xea   :  { %v884_v20 = vpop.f32.mrf.mxu1  ;;  %v644_v29 = vadd.f32 %v882_v24, %v604_v23 }
 0x103   :  { %v902_v25 = vpop.f32.mrf.mxu0 }
 0x104   :  { %v924_v26 = vpop.f32.mrf.mxu1 }
 0x105   :  { %v903_v27 = vpop.f32.mrf.mxu0 }
 0x106   :  { %v925_v28 = vpop.f32.mrf.mxu1  ;;  %v904_v30 = vadd.f32 %v903_v27, %v902_v25 }
 0x107   :  { %v905_v31 = vpop.f32.mrf.mxu0  ;;  %v926_v34 = vadd.f32 %v925_v28, %v924_v26 }
 0x108   :  { %v927_v32 = vpop.f32.mrf.mxu1  ;;  %v684_v33 = vadd.f32 %v904_v30, %v644_v29 }
 0x109   :  { %v906_v35 = vpop.f32.mrf.mxu0 }
 0x10a   :  { %v928_v36 = vpop.f32.mrf.mxu1  ;;  %v724_v37 = vadd.f32 %v926_v34, %v684_v33 }
 0x10c   :  { %v730_v38 = vrot.slane %v724_v37, 4  ;;  %v737_v39 = vmul.f32 %v724_v37, %v724_v37  ;;  %v745_v40 = vsub.f32 0.0, %v724_v37 }
 0x10e   :  { %v731_v41 = vadd.f32 %v730_v38, %v724_v37  ;;  %v738_v42 = vrot.slane %v737_v39, 4  ;;  %v746_v43 = vmul.f32 1.442695, %v745_v40 }
 0x110   :  { %1004 = vpow2.f32 %v746_v43  ;;  %v732_v44 = vrot.slane %v731_v41, 2  ;;  %v739_v45 = vadd.f32 %v738_v42, %v737_v39 }
 0x112   :  { %v733_v46 = vadd.f32 %v732_v44, %v731_v41  ;;  %v740_v47 = vrot.slane %v739_v45, 2 }
 0x114   :  { %v734_v48 = vrot.slane %v733_v46, 1  ;;  %v741_v49 = vadd.f32 %v740_v47, %v739_v45 }
 0x116   :  { %v735_v50 = vadd.f32 %v734_v48, %v733_v46  ;;  %v742_v51 = vrot.slane %v741_v49, 1 }
 0x118   :  { %736 = vst [vmem:[#allocation2] sm:$0x1] %v735_v50  ;;  %v743_v52 = vadd.f32 %v742_v51, %v741_v49 }
 0x11a   :  { %744 = vst [vmem:[#allocation2 + $0x1] sm:$0x1] %v743_v52 }
 0x11b   :  { %1019 = shalt.err (!%p1016_p4)
}
 0x11c   :  { %762 = dma.vmem_to_hbm [thread:$0]  %s760_s21, 128, %s1274_s4, [#allocation3]  }
 0x11d   :  { %v1005_v53 = vpop.eup %1004 }
 0x11e   :  { %v748_v54 = vadd.f32 1.0, %v1005_v53 }
 0x120   :  { %1006 = vrcp.f32 %v748_v54 }
 0x12d   :  { %v1007_v55 = vpop.eup %1006 }
 0x12e   :  { %750 = vst [vmem:[%s1273_s3] sm:$0xff] %v1007_v55 }
 0x12f   :  { %1028 = dma.done.wait [#allocation3], 128  }
 0x130   :  { %1029 = vsyncadd [#allocation3], 4294967168 }
 0x131   :  { %768 = vsyncpa [#allocation3], 1 }

</bundles_post_ra>
